<compile_context>
chip_gen: v7x
topology: tpu7x:2x2x1
jax: 0.10.0
libtpu: 0.0.40
codegen_flags: <defaults>
</compile_context>

<pallas_src>
import math
import functools
import numpy as np

import jax
import jax.numpy as jnp
from jax.experimental import pallas as pl
from jax.experimental.pallas import tpu as pltpu

F32_MIN = float(np.finfo(np.float32).min)


def _mha_kernel(h, d_k, n_feat, use_query_mask, residual, compute_dtype,
                q_in_ref, k_in_ref, v_in_ref, mask_ref, qmask_ref,
                wq_ref, bq_ref, wk_ref, bk_ref, wv_ref, bv_ref,
                wfc_ref, wfq_ref, bf_ref,
                out_ref, attn_ref,
                k_scr, v_scr):
    """Grid = (batch, T1_tile).  Shapes seen by the kernel:

      q_in_ref : (1, tile_t1, F)        k_in_ref / v_in_ref : (1, T2, F)
      mask_ref : (1, tile_t1, T2) bf16  (1.0 == masked)
      qmask_ref: (1, tile_t1, 1)  f32
      wq/wk/wv : (h, F, d_k) compute_dtype     bq/bk/bv : (h, 1, d_k) f32
      wfc      : (h, d_k, F)   wfq : (F, F)    bf : (1, F)
      out_ref  : (1, tile_t1, F)        attn_ref : (h, 1, tile_t1, T2)
      k_scr/v_scr : (h, T2, d_k) compute_dtype (persist across the T1-tile axis)
    """
    t_idx = pl.program_id(1)
    tile_t1 = q_in_ref.shape[1]
    t2 = k_in_ref.shape[1]
    scale = 1.0 / math.sqrt(d_k)

    # ---- K/V projections: computed once per batch element (first T1 tile),
    #      cached in VMEM scratch and reused by every later T1 tile. ----------
    @pl.when(t_idx == 0)
    def _project_kv():
        key_in = k_in_ref[0].astype(compute_dtype)                    # (T2, F)
        val_in = v_in_ref[0].astype(compute_dtype)
        key_b = jnp.broadcast_to(key_in[None], (h, t2, n_feat))
        val_b = jnp.broadcast_to(val_in[None], (h, t2, n_feat))
        # one head-batched contraction per stage (no per-head lane slicing)
        kh = jnp.einsum('htf,hfd->htd', key_b, wk_ref[...],
                        preferred_element_type=jnp.float32) + bk_ref[...]
        vh = jnp.einsum('htf,hfd->htd', val_b, wv_ref[...],
                        preferred_element_type=jnp.float32) + bv_ref[...]
        k_scr[...] = kh.astype(compute_dtype)
        v_scr[...] = vh.astype(compute_dtype)

    # ---- Q projection for this T1 tile (head-batched). ----------------------
    query_f32 = q_in_ref[0].astype(jnp.float32)                       # (tile, F)
    query_c = query_f32.astype(compute_dtype)
    q_b = jnp.broadcast_to(query_c[None], (h, tile_t1, n_feat))
    qh = jnp.einsum('htf,hfd->htd', q_b, wq_ref[...],
                    preferred_element_type=jnp.float32) + bq_ref[...]
    qh = (qh * scale).astype(compute_dtype)                           # (h, tile, d_k)

    # ---- Scores: one batched contraction over d_k; the "transposed" K operand
    #      is consumed via dot_general contracting dims (no explicit k.T). ----
    scores = jnp.einsum('htd,hsd->hts', qh, k_scr[...],
                        preferred_element_type=jnp.float32)           # (h, tile, T2)

    masked = mask_ref[0].astype(jnp.float32) > 0.0                    # (tile, T2)
    masked3 = jnp.broadcast_to(masked[None], (h, tile_t1, t2))        # hoisted once
    scores = jnp.where(masked3, F32_MIN, scores)

    # ---- Softmax over T2 in f32; divide goes to the EUP via pl.reciprocal. --
    s_max = jnp.max(scores, axis=-1, keepdims=True)
    e = jnp.exp(scores - s_max)
    denom = jnp.sum(e, axis=-1, keepdims=True)
    attn = e * pl.reciprocal(denom, approx=True)
    attn = jnp.where(masked3, 0.0, attn)
    if use_query_mask:
        attn = attn * qmask_ref[0]                                    # (tile, 1) bcast
    # TODO(synk): attn_dropout / dropout (train mode) not implemented (eval mode).

    attn_ref[:, 0, :, :] = attn.astype(attn_ref.dtype)

    # ---- Context: batched attn @ V. ------------------------------------------
    ctx = jnp.einsum('hts,hsd->htd', attn.astype(compute_dtype), v_scr[...],
                     preferred_element_type=jnp.float32)              # (h, tile, d_k)

    if residual:
        # final_linear(cat([ctx, query], -1)) + query
        #   == sum_h ctx_h @ Wf_ctx[h]  +  query @ Wf_q  +  bf  +  query
        acc = jnp.dot(query_c, wfq_ref[...], preferred_element_type=jnp.float32)
        ctx_c = ctx.astype(compute_dtype)
        for head in range(h):
            # (tile, d_k) @ (d_k, F): full-N MXU matmuls, no lane slicing, no
            # concat relayout; accumulator stays a single (tile, F) f32 slab.
            acc = acc + jnp.dot(ctx_c[head], wfc_ref[head],
                                preferred_element_type=jnp.float32)
        res = acc + bf_ref[...] + query_f32
    else:
        # head-major concat == PyTorch permute(1, 2, 0, 3).view(B, T1, F)
        res = jnp.concatenate([ctx[head] for head in range(h)], axis=-1)

    out_ref[0] = res.astype(out_ref.dtype)


def multi_headed_attention_v2(query, key, value, mask, params, n_head,
                              query_mask=None, residual=True,
                              t1_tile=None, compute_dtype=jnp.bfloat16,
                              attn_dtype=jnp.float32):
    """Pallas implementation of MultiHeadedAttention_v2.forward (eval mode)."""
    B, T1, F = query.shape
    T2 = key.shape[1]
    assert F % n_head == 0
    d_k = F // n_head

    # T1 tiling: bounds per-step VMEM (scores are (tile, T2) f32 per head).
    if t1_tile is None:
        t1_tile = T1 if T1 <= 256 else (256 if T1 % 256 == 0 else T1)
    assert T1 % t1_tile == 0
    n_t1 = T1 // t1_tile

    use_qm = query_mask is not None
    if query_mask is None:
        qm = jnp.ones((B, T1, 1), jnp.float32)
    else:
        qm = query_mask.astype(jnp.float32).reshape(B, T1, 1)

    # mask ships at half width (bf16 0/1) to halve mask DMA vs int32.
    mask_x = (mask != 0).astype(jnp.bfloat16)

    wq, bq, wk, bk, wv, bv, wf, bf = params

    def head_w(w):   # (F, F) -> (h, F, d_k), head-major output columns
        return jnp.transpose(w.reshape(F, n_head, d_k), (1, 0, 2)).astype(compute_dtype)

    def head_b(b):   # (1, F) / (F,) -> (h, 1, d_k), kept f32
        return b.reshape(n_head, 1, d_k).astype(jnp.float32)

    wq_h, wk_h, wv_h = head_w(wq), head_w(wk), head_w(wv)
    bq_h, bk_h, bv_h = head_b(bq), head_b(bk), head_b(bv)
    wf_f = wf.astype(jnp.float32)
    wfc = wf_f[:F].reshape(n_head, d_k, F).astype(compute_dtype)   # ctx half, head-major rows
    wfq = wf_f[F:].astype(compute_dtype)                           # query half, (F, F)
    bf2 = bf.reshape(1, F).astype(jnp.float32)

    kernel = functools.partial(_mha_kernel, n_head, d_k, F, use_qm, residual,
                               compute_dtype)

    in_specs = [
        pl.BlockSpec((1, t1_tile, F), lambda b, t: (b, t, 0)),      # query
        pl.BlockSpec((1, T2, F), lambda b, t: (b, 0, 0)),           # key
        pl.BlockSpec((1, T2, F), lambda b, t: (b, 0, 0)),           # value
        pl.BlockSpec((1, t1_tile, T2), lambda b, t: (b, t, 0)),     # mask (bf16)
        pl.BlockSpec((1, t1_tile, 1), lambda b, t: (b, t, 0)),      # query_mask
        pl.BlockSpec((n_head, F, d_k), lambda b, t: (0, 0, 0)),     # Wq
        pl.BlockSpec((n_head, 1, d_k), lambda b, t: (0, 0, 0)),     # bq
        pl.BlockSpec((n_head, F, d_k), lambda b, t: (0, 0, 0)),     # Wk
        pl.BlockSpec((n_head, 1, d_k), lambda b, t: (0, 0, 0)),     # bk
        pl.BlockSpec((n_head, F, d_k), lambda b, t: (0, 0, 0)),     # Wv
        pl.BlockSpec((n_head, 1, d_k), lambda b, t: (0, 0, 0)),     # bv
        pl.BlockSpec((n_head, d_k, F), lambda b, t: (0, 0, 0)),     # Wf (ctx half)
        pl.BlockSpec((F, F), lambda b, t: (0, 0)),                  # Wf (query half)
        pl.BlockSpec((1, F), lambda b, t: (0, 0)),                  # bf
    ]
    out_specs = (
        pl.BlockSpec((1, t1_tile, F), lambda b, t: (b, t, 0)),
        pl.BlockSpec((n_head, 1, t1_tile, T2), lambda b, t: (0, b, t, 0)),
    )

    out, attn = pl.pallas_call(
        kernel,
        out_shape=(jax.ShapeDtypeStruct((B, T1, F), jnp.float32),
                   jax.ShapeDtypeStruct((n_head, B, T1, T2), attn_dtype)),
        grid=(B, n_t1),
        in_specs=in_specs,
        out_specs=out_specs,
        scratch_shapes=[pltpu.VMEM((n_head, T2, d_k), compute_dtype),   # K cache
                        pltpu.VMEM((n_head, T2, d_k), compute_dtype)],  # V cache
        compiler_params=pltpu.CompilerParams(
            # batch is independent -> megacore-parallel; T1-tile axis carries
            # the K/V scratch cache -> arbitrary (sequential).
            dimension_semantics=("parallel", "arbitrary"),
            vmem_limit_bytes=48 * 1024 * 1024),
    )(query, key, value, mask_x, qm, wq_h, bq_h, wk_h, bk_h, wv_h, bv_h,
      wfc, wfq, bf2)

    # (h, B, T1, T2) -> (h*B, T1, T2): head-major, matches the PyTorch view.
    attn = attn.reshape(n_head * B, T1, T2)
    return out, attn


def reference_jax(query, key, value, mask, params, n_head,
                  query_mask=None, residual=True):
    """Pure-JAX transcription of the PyTorch forward (eval mode), for checking."""
    wq, bq, wk, bk, wv, bv, wf, bf = params
    B, T1, F = query.shape
    T2 = key.shape[1]
    d_k = F // n_head

    q = query @ wq + bq
    k = key @ wk + bk
    v = value @ wv + bv

    def split(x, T):
        return x.reshape(B, T, n_head, d_k).transpose(2, 0, 1, 3).reshape(n_head * B, T, d_k)

    qh, kh, vh = split(q, T1), split(k, T2), split(v, T2)
    scores = jnp.einsum('btd,bsd->bts', qh, kh) / math.sqrt(d_k)
    mask_t = jnp.tile(mask, (n_head, 1, 1))
    scores = jnp.where(mask_t, F32_MIN, scores)
    attn = jax.nn.softmax(scores, axis=-1)
    attn = jnp.where(mask_t, 0.0, attn)
    if query_mask is not None:
        qmf = jnp.tile(query_mask[:, :, None].astype(jnp.float32), (n_head, 1, T2))
        attn = attn * qmf
    x = jnp.einsum('bts,bsd->btd', attn, vh)
    x = x.reshape(n_head, B, T1, d_k).transpose(1, 2, 0, 3).reshape(B, T1, F)
    if residual:
        res = jnp.concatenate([x, query], axis=-1) @ wf + bf + query
    else:
        res = x
    return res, attn


def _make_mask(B, T1, T2, lengths):
    m = jnp.arange(T2)[None, None, :] >= lengths[:, None, None]
    return jnp.broadcast_to(m, (B, T1, T2))


if __name__ == "__main__":
    n_head, n_feat = 4, 32

    key_rng = jax.random.PRNGKey(0)
    ks = jax.random.split(key_rng, 8)

    def lin(kw, kb, fin, fout):
        # deterministic "Linear" params; stored pre-transposed as (in, out)
        w = jax.random.normal(kw, (fin, fout), jnp.float32) * 0.1
        b = jax.random.normal(kb, (1, fout), jnp.float32) * 0.1
        return w, b

    wq, bq = lin(ks[0], ks[1], n_feat, n_feat)
    wk, bk = lin(ks[2], ks[3], n_feat, n_feat)
    wv, bv = lin(ks[4], ks[5], n_feat, n_feat)
    wf, bf = lin(ks[6], ks[7], 2 * n_feat, n_feat)
    params = (wq, bq, wk, bk, wv, bv, wf, bf)

    cases = [
        dict(name="base", B=2, T1=8, T2=8, use_qm=False, t1_tile=None),
        dict(name="query_mask", B=2, T1=8, T2=8, use_qm=True, t1_tile=None),
        dict(name="t1_tiled", B=2, T1=32, T2=8, use_qm=False, t1_tile=16),
    ]

    for i, c in enumerate(cases):
        k_act = jax.random.fold_in(key_rng, i + 1)
        kq, kk, kv = jax.random.split(k_act, 3)
        B, T1, T2 = c["B"], c["T1"], c["T2"]
        query = jax.random.normal(kq, (B, T1, n_feat), jnp.float32)
        key = jax.random.normal(kk, (B, T2, n_feat), jnp.float32)
        value = jax.random.normal(kv, (B, T2, n_feat), jnp.float32)

        # key-padding style mask: True == masked position
        lengths = jnp.array([T2, max(1, T2 - 3)], jnp.int32)
        mask = _make_mask(B, T1, T2, lengths)

        if c["use_qm"]:
            q_lens = jnp.array([T1, max(1, T1 - 3)], jnp.int32)
            query_mask = jnp.arange(T1)[None, :] < q_lens[:, None]
        else:
            query_mask = None

        out, attn = multi_headed_attention_v2(
            query, key, value, mask, params, n_head,
            query_mask=query_mask, residual=True, t1_tile=c["t1_tile"])
        out, attn = jax.block_until_ready((out, attn))

        ref_out, ref_attn = reference_jax(query, key, value, mask, params, n_head,
                                          query_mask=query_mask, residual=True)

        # Kernel runs matmuls with bf16 inputs (f32 accumulation) and uses the
        # EUP approx reciprocal in the softmax, so compare against the exact
        # f32 reference with a correspondingly loose tolerance.
        np.testing.assert_allclose(np.asarray(out), np.asarray(ref_out),
                                   rtol=3e-2, atol=3e-2, err_msg=c["name"])
        np.testing.assert_allclose(np.asarray(attn), np.asarray(ref_attn),
                                   rtol=3e-2, atol=3e-2, err_msg=c["name"])

    print("KERNEL_OK")
</pallas_src>

<mosaic_0001>
module attributes {stable_mosaic.version = 11 : i64} {
  func.func @_mha_kernel(%arg0: i32, %arg1: i32, %arg2: memref<1x8x32xf32, #tpu.memory_space<vmem>>, %arg3: memref<1x8x32xf32, #tpu.memory_space<vmem>>, %arg4: memref<1x8x32xf32, #tpu.memory_space<vmem>>, %arg5: memref<1x8x8xbf16, #tpu.memory_space<vmem>>, %arg6: memref<1x8x1xf32, #tpu.memory_space<vmem>>, %arg7: memref<4x32x8xbf16, #tpu.memory_space<vmem>>, %arg8: memref<4x1x8xf32, #tpu.memory_space<vmem>>, %arg9: memref<4x32x8xbf16, #tpu.memory_space<vmem>>, %arg10: memref<4x1x8xf32, #tpu.memory_space<vmem>>, %arg11: memref<4x32x8xbf16, #tpu.memory_space<vmem>>, %arg12: memref<4x1x8xf32, #tpu.memory_space<vmem>>, %arg13: memref<4x8x32xbf16, #tpu.memory_space<vmem>>, %arg14: memref<32x32xbf16, #tpu.memory_space<vmem>>, %arg15: memref<1x32xf32, #tpu.memory_space<vmem>>, %arg16: memref<1x8x32xf32, #tpu.memory_space<vmem>>, %arg17: memref<4x1x8x8xf32, #tpu.memory_space<vmem>>, %arg18: memref<4x8x8xbf16, #tpu.memory_space<vmem>>, %arg19: memref<4x8x8xbf16, #tpu.memory_space<vmem>>) attributes {dimension_semantics = [#tpu.dimension_semantics<parallel>, #tpu.dimension_semantics<arbitrary>], iteration_bounds = array<i64: 2, 1>, scalar_prefetch = 0 : i64, scratch_operands = 2 : i64, tpu.core_type = #tpu.core_type<tc>, window_params = [{transform_indices = @transform_0, window_bounds = array<i64: 1, 8, 32>}, {transform_indices = @transform_1, window_bounds = array<i64: 1, 8, 32>}, {transform_indices = @transform_2, window_bounds = array<i64: 1, 8, 32>}, {transform_indices = @transform_3, window_bounds = array<i64: 1, 8, 8>}, {transform_indices = @transform_4, window_bounds = array<i64: 1, 8, 1>}, {pipeline_mode = #tpu.pipeline_mode<synchronous>, transform_indices = @transform_5, window_bounds = array<i64: 4, 32, 8>}, {pipeline_mode = #tpu.pipeline_mode<synchronous>, transform_indices = @transform_6, window_bounds = array<i64: 4, 1, 8>}, {pipeline_mode = #tpu.pipeline_mode<synchronous>, transform_indices = @transform_7, window_bounds = array<i64: 4, 32, 8>}, {pipeline_mode = #tpu.pipeline_mode<synchronous>, transform_indices = @transform_8, window_bounds = array<i64: 4, 1, 8>}, {pipeline_mode = #tpu.pipeline_mode<synchronous>, transform_indices = @transform_9, window_bounds = array<i64: 4, 32, 8>}, {pipeline_mode = #tpu.pipeline_mode<synchronous>, transform_indices = @transform_10, window_bounds = array<i64: 4, 1, 8>}, {pipeline_mode = #tpu.pipeline_mode<synchronous>, transform_indices = @transform_11, window_bounds = array<i64: 4, 8, 32>}, {pipeline_mode = #tpu.pipeline_mode<synchronous>, transform_indices = @transform_12, window_bounds = array<i64: 32, 32>}, {pipeline_mode = #tpu.pipeline_mode<synchronous>, transform_indices = @transform_13, window_bounds = array<i64: 1, 32>}, {transform_indices = @transform_14, window_bounds = array<i64: 1, 8, 32>}, {transform_indices = @transform_15, window_bounds = array<i64: 4, 1, 8, 8>}]} {
    %c0_i32 = arith.constant 0 : i32
    %0 = arith.cmpi eq, %arg1, %c0_i32 : i32
    %1 = arith.extui %0 : i1 to i32
    %c0_i32_0 = arith.constant 0 : i32
    %2 = arith.cmpi ne, %1, %c0_i32_0 : i32
    scf.if %2 {
      %c0_51 = arith.constant 0 : index
      %c0_52 = arith.constant 0 : index
      %c0_53 = arith.constant 0 : index
      %81 = vector.load %arg3[%c0_51, %c0_52, %c0_53] : memref<1x8x32xf32, #tpu.memory_space<vmem>>, vector<1x8x32xf32>
      %82 = vector.shape_cast %81 : vector<1x8x32xf32> to vector<8x32xf32>
      %83 = arith.truncf %82 : vector<8x32xf32> to vector<8x32xbf16>
      %c0_54 = arith.constant 0 : index
      %c0_55 = arith.constant 0 : index
      %c0_56 = arith.constant 0 : index
      %84 = vector.load %arg4[%c0_54, %c0_55, %c0_56] : memref<1x8x32xf32, #tpu.memory_space<vmem>>, vector<1x8x32xf32>
      %85 = vector.shape_cast %84 : vector<1x8x32xf32> to vector<8x32xf32>
      %86 = arith.truncf %85 : vector<8x32xf32> to vector<8x32xbf16>
      %87 = vector.shape_cast %83 : vector<8x32xbf16> to vector<1x8x32xbf16>
      %88 = vector.shape_cast %87 : vector<1x8x32xbf16> to vector<1x8x32xbf16>
      %89 = vector.broadcast %88 : vector<1x8x32xbf16> to vector<4x8x32xbf16>
      %90 = vector.shape_cast %86 : vector<8x32xbf16> to vector<1x8x32xbf16>
      %91 = vector.shape_cast %90 : vector<1x8x32xbf16> to vector<1x8x32xbf16>
      %92 = vector.broadcast %91 : vector<1x8x32xbf16> to vector<4x8x32xbf16>
      %c0_57 = arith.constant 0 : index
      %c0_58 = arith.constant 0 : index
      %c0_59 = arith.constant 0 : index
      %93 = vector.load %arg9[%c0_57, %c0_58, %c0_59] : memref<4x32x8xbf16, #tpu.memory_space<vmem>>, vector<4x32x8xbf16>
      "tpu.trace_start"() <{level = 10 : i32, message = "htf,hfd->htd"}> : () -> ()
      %cst_60 = arith.constant dense<0.000000e+00> : vector<4x8x8xf32>
      %94 = tpu.matmul %89, %93, %cst_60 {dimension_numbers = #tpu.dot_dimension_numbers<[2], [1], [1], [2], [0, 0, 0, 1, 1, 2], [0], [0]>} : vector<4x8x32xbf16>, vector<4x32x8xbf16>, vector<4x8x8xf32> -> vector<4x8x8xf32>
      "tpu.trace_stop"() : () -> ()
      %c0_61 = arith.constant 0 : index
      %c0_62 = arith.constant 0 : index
      %c0_63 = arith.constant 0 : index
      %95 = vector.load %arg10[%c0_61, %c0_62, %c0_63] : memref<4x1x8xf32, #tpu.memory_space<vmem>>, vector<4x1x8xf32>
      %96 = vector.broadcast %95 : vector<4x1x8xf32> to vector<4x8x8xf32>
      %97 = arith.addf %94, %96 : vector<4x8x8xf32>
      %c0_64 = arith.constant 0 : index
      %c0_65 = arith.constant 0 : index
      %c0_66 = arith.constant 0 : index
      %98 = vector.load %arg11[%c0_64, %c0_65, %c0_66] : memref<4x32x8xbf16, #tpu.memory_space<vmem>>, vector<4x32x8xbf16>
      "tpu.trace_start"() <{level = 10 : i32, message = "htf,hfd->htd"}> : () -> ()
      %cst_67 = arith.constant dense<0.000000e+00> : vector<4x8x8xf32>
      %99 = tpu.matmul %92, %98, %cst_67 {dimension_numbers = #tpu.dot_dimension_numbers<[2], [1], [1], [2], [0, 0, 0, 1, 1, 2], [0], [0]>} : vector<4x8x32xbf16>, vector<4x32x8xbf16>, vector<4x8x8xf32> -> vector<4x8x8xf32>
      "tpu.trace_stop"() : () -> ()
      %c0_68 = arith.constant 0 : index
      %c0_69 = arith.constant 0 : index
      %c0_70 = arith.constant 0 : index
      %100 = vector.load %arg12[%c0_68, %c0_69, %c0_70] : memref<4x1x8xf32, #tpu.memory_space<vmem>>, vector<4x1x8xf32>
      %101 = vector.broadcast %100 : vector<4x1x8xf32> to vector<4x8x8xf32>
      %102 = arith.addf %99, %101 : vector<4x8x8xf32>
      %103 = arith.truncf %97 : vector<4x8x8xf32> to vector<4x8x8xbf16>
      %c0_71 = arith.constant 0 : index
      %c0_72 = arith.constant 0 : index
      %c0_73 = arith.constant 0 : index
      %104 = vector.load %arg18[%c0_71, %c0_72, %c0_73] : memref<4x8x8xbf16, #tpu.memory_space<vmem>>, vector<4x8x8xbf16>
      tpu.vector_store %arg18[%c0_71, %c0_72, %c0_73], %103 {strides = array<i32>} : memref<4x8x8xbf16, #tpu.memory_space<vmem>>, vector<4x8x8xbf16>,
      %105 = arith.truncf %102 : vector<4x8x8xf32> to vector<4x8x8xbf16>
      %c0_74 = arith.constant 0 : index
      %c0_75 = arith.constant 0 : index
      %c0_76 = arith.constant 0 : index
      %106 = vector.load %arg19[%c0_74, %c0_75, %c0_76] : memref<4x8x8xbf16, #tpu.memory_space<vmem>>, vector<4x8x8xbf16>
      tpu.vector_store %arg19[%c0_74, %c0_75, %c0_76], %105 {strides = array<i32>} : memref<4x8x8xbf16, #tpu.memory_space<vmem>>, vector<4x8x8xbf16>,
    } else {
    }
    %c0 = arith.constant 0 : index
    %c0_1 = arith.constant 0 : index
    %c0_2 = arith.constant 0 : index
    %3 = vector.load %arg2[%c0, %c0_1, %c0_2] : memref<1x8x32xf32, #tpu.memory_space<vmem>>, vector<1x8x32xf32>
    %4 = vector.shape_cast %3 : vector<1x8x32xf32> to vector<8x32xf32>
    %5 = arith.truncf %4 : vector<8x32xf32> to vector<8x32xbf16>
    %6 = vector.shape_cast %5 : vector<8x32xbf16> to vector<1x8x32xbf16>
    %7 = vector.shape_cast %6 : vector<1x8x32xbf16> to vector<1x8x32xbf16>
    %8 = vector.broadcast %7 : vector<1x8x32xbf16> to vector<4x8x32xbf16>
    %c0_3 = arith.constant 0 : index
    %c0_4 = arith.constant 0 : index
    %c0_5 = arith.constant 0 : index
    %9 = vector.load %arg7[%c0_3, %c0_4, %c0_5] : memref<4x32x8xbf16, #tpu.memory_space<vmem>>, vector<4x32x8xbf16>
    "tpu.trace_start"() <{level = 10 : i32, message = "htf,hfd->htd"}> : () -> ()
    %cst = arith.constant dense<0.000000e+00> : vector<4x8x8xf32>
    %10 = tpu.matmul %8, %9, %cst {dimension_numbers = #tpu.dot_dimension_numbers<[2], [1], [1], [2], [0, 0, 0, 1, 1, 2], [0], [0]>} : vector<4x8x32xbf16>, vector<4x32x8xbf16>, vector<4x8x8xf32> -> vector<4x8x8xf32>
    "tpu.trace_stop"() : () -> ()
    %c0_6 = arith.constant 0 : index
    %c0_7 = arith.constant 0 : index
    %c0_8 = arith.constant 0 : index
    %11 = vector.load %arg8[%c0_6, %c0_7, %c0_8] : memref<4x1x8xf32, #tpu.memory_space<vmem>>, vector<4x1x8xf32>
    %12 = vector.broadcast %11 : vector<4x1x8xf32> to vector<4x8x8xf32>
    %13 = arith.addf %10, %12 : vector<4x8x8xf32>
    %cst_9 = arith.constant 0.353553385 : f32
    %14 = vector.broadcast %cst_9 : f32 to vector<4x8x8xf32>
    %15 = arith.mulf %13, %14 : vector<4x8x8xf32>
    %16 = arith.truncf %15 : vector<4x8x8xf32> to vector<4x8x8xbf16>
    %c0_10 = arith.constant 0 : index
    %c0_11 = arith.constant 0 : index
    %c0_12 = arith.constant 0 : index
    %17 = vector.load %arg18[%c0_10, %c0_11, %c0_12] : memref<4x8x8xbf16, #tpu.memory_space<vmem>>, vector<4x8x8xbf16>
    "tpu.trace_start"() <{level = 10 : i32, message = "htd,hsd->hts"}> : () -> ()
    %cst_13 = arith.constant dense<0.000000e+00> : vector<4x8x8xf32>
    %18 = tpu.matmul %16, %17, %cst_13 {dimension_numbers = #tpu.dot_dimension_numbers<[2], [2], [1], [1], [0, 0, 0, 1, 1, 1], [0], [0]>} : vector<4x8x8xbf16>, vector<4x8x8xbf16>, vector<4x8x8xf32> -> vector<4x8x8xf32>
    "tpu.trace_stop"() : () -> ()
    %c0_14 = arith.constant 0 : index
    %c0_15 = arith.constant 0 : index
    %c0_16 = arith.constant 0 : index
    %19 = vector.load %arg5[%c0_14, %c0_15, %c0_16] : memref<1x8x8xbf16, #tpu.memory_space<vmem>>, vector<1x8x8xbf16>
    %20 = vector.shape_cast %19 : vector<1x8x8xbf16> to vector<8x8xbf16>
    %21 = arith.extf %20 : vector<8x8xbf16> to vector<8x8xf32>
    %cst_17 = arith.constant 0.000000e+00 : f32
    %22 = vector.broadcast %cst_17 : f32 to vector<8x8xf32>
    %23 = arith.cmpf ogt, %21, %22 : vector<8x8xf32>
    %24 = vector.shape_cast %23 : vector<8x8xi1> to vector<1x8x8xi1>
    %25 = vector.shape_cast %24 : vector<1x8x8xi1> to vector<1x8x8xi1>
    %26 = vector.broadcast %25 : vector<1x8x8xi1> to vector<4x8x8xi1>
    %cst_18 = arith.constant -3.40282347E+38 : f32
    %27 = vector.broadcast %cst_18 : f32 to vector<4x8x8xf32>
    %28 = arith.select %26, %27, %18 : vector<4x8x8xi1>, vector<4x8x8xf32>
    %cst_19 = arith.constant dense<0xFF800000> : vector<4x8xf32>
    %29 = vector.multi_reduction <maximumf>, %28, %cst_19 [2] : vector<4x8x8xf32> to vector<4x8xf32>
    %30 = vector.shape_cast %29 : vector<4x8xf32> to vector<4x8x1xf32>
    %31 = vector.broadcast %30 : vector<4x8x1xf32> to vector<4x8x8xf32>
    %32 = arith.subf %28, %31 : vector<4x8x8xf32>
    %33 = math.exp %32 : vector<4x8x8xf32>
    %cst_20 = arith.constant dense<0.000000e+00> : vector<4x8xf32>
    %34 = vector.multi_reduction <add>, %33, %cst_20 [2] : vector<4x8x8xf32> to vector<4x8xf32>
    %35 = vector.shape_cast %34 : vector<4x8xf32> to vector<4x8x1xf32>
    %36 = tpu.reciprocal %35 {approx = true} : vector<4x8x1xf32> -> vector<4x8x1xf32>
    %37 = vector.broadcast %36 : vector<4x8x1xf32> to vector<4x8x8xf32>
    %38 = arith.mulf %33, %37 : vector<4x8x8xf32>
    %cst_21 = arith.constant 0.000000e+00 : f32
    %39 = vector.broadcast %cst_21 : f32 to vector<4x8x8xf32>
    %40 = arith.select %26, %39, %38 : vector<4x8x8xi1>, vector<4x8x8xf32>
    %c0_22 = arith.constant 0 : index
    %c0_23 = arith.constant 0 : index
    %c0_24 = arith.constant 0 : index
    %c0_25 = arith.constant 0 : index
    %41 = vector.load %arg17[%c0_22, %c0_23, %c0_24, %c0_25] : memref<4x1x8x8xf32, #tpu.memory_space<vmem>>, vector<4x1x8x8xf32>
    %42 = vector.shape_cast %41 : vector<4x1x8x8xf32> to vector<4x8x8xf32>
    %43 = vector.shape_cast %40 : vector<4x8x8xf32> to vector<4x1x8x8xf32>
    tpu.vector_store %arg17[%c0_22, %c0_23, %c0_24, %c0_25], %43 {strides = array<i32>} : memref<4x1x8x8xf32, #tpu.memory_space<vmem>>, vector<4x1x8x8xf32>,
    %44 = arith.truncf %40 : vector<4x8x8xf32> to vector<4x8x8xbf16>
    %c0_26 = arith.constant 0 : index
    %c0_27 = arith.constant 0 : index
    %c0_28 = arith.constant 0 : index
    %45 = vector.load %arg19[%c0_26, %c0_27, %c0_28] : memref<4x8x8xbf16, #tpu.memory_space<vmem>>, vector<4x8x8xbf16>
    "tpu.trace_start"() <{level = 10 : i32, message = "hts,hsd->htd"}> : () -> ()
    %cst_29 = arith.constant dense<0.000000e+00> : vector<4x8x8xf32>
    %46 = tpu.matmul %44, %45, %cst_29 {dimension_numbers = #tpu.dot_dimension_numbers<[2], [1], [1], [2], [0, 0, 0, 1, 1, 2], [0], [0]>} : vector<4x8x8xbf16>, vector<4x8x8xbf16>, vector<4x8x8xf32> -> vector<4x8x8xf32>
    "tpu.trace_stop"() : () -> ()
    %c0_30 = arith.constant 0 : index
    %c0_31 = arith.constant 0 : index
    %47 = vector.load %arg14[%c0_30, %c0_31] : memref<32x32xbf16, #tpu.memory_space<vmem>>, vector<32x32xbf16>
    %cst_32 = arith.constant dense<0.000000e+00> : vector<8x32xf32>
    %48 = tpu.matmul %5, %47, %cst_32 {dimension_numbers = #tpu.dot_dimension_numbers<[1], [0], [0], [1], [0, 0, 1, 1], [], []>} : vector<8x32xbf16>, vector<32x32xbf16>, vector<8x32xf32> -> vector<8x32xf32>
    %49 = arith.truncf %46 : vector<4x8x8xf32> to vector<4x8x8xbf16>
    %50 = vector.extract_strided_slice %49 {offsets = [0, 0, 0], sizes = [1, 8, 8], strides = [1, 1, 1]} : vector<4x8x8xbf16> to vector<1x8x8xbf16>
    %51 = vector.shape_cast %50 : vector<1x8x8xbf16> to vector<8x8xbf16>
    %c0_33 = arith.constant 0 : index
    %c0_34 = arith.constant 0 : index
    %c0_35 = arith.constant 0 : index
    %52 = vector.load %arg13[%c0_33, %c0_34, %c0_35] : memref<4x8x32xbf16, #tpu.memory_space<vmem>>, vector<1x8x32xbf16>
    %53 = vector.shape_cast %52 : vector<1x8x32xbf16> to vector<8x32xbf16>
    %cst_36 = arith.constant dense<0.000000e+00> : vector<8x32xf32>
    %54 = tpu.matmul %51, %53, %cst_36 {dimension_numbers = #tpu.dot_dimension_numbers<[1], [0], [0], [1], [0, 0, 1, 1], [], []>} : vector<8x8xbf16>, vector<8x32xbf16>, vector<8x32xf32> -> vector<8x32xf32>
    %55 = arith.addf %48, %54 : vector<8x32xf32>
    %56 = vector.extract_strided_slice %49 {offsets = [1, 0, 0], sizes = [1, 8, 8], strides = [1, 1, 1]} : vector<4x8x8xbf16> to vector<1x8x8xbf16>
    %57 = vector.shape_cast %56 : vector<1x8x8xbf16> to vector<8x8xbf16>
    %c1 = arith.constant 1 : index
    %c0_37 = arith.constant 0 : index
    %c0_38 = arith.constant 0 : index
    %58 = vector.load %arg13[%c1, %c0_37, %c0_38] : memref<4x8x32xbf16, #tpu.memory_space<vmem>>, vector<1x8x32xbf16>
    %59 = vector.shape_cast %58 : vector<1x8x32xbf16> to vector<8x32xbf16>
    %cst_39 = arith.constant dense<0.000000e+00> : vector<8x32xf32>
    %60 = tpu.matmul %57, %59, %cst_39 {dimension_numbers = #tpu.dot_dimension_numbers<[1], [0], [0], [1], [0, 0, 1, 1], [], []>} : vector<8x8xbf16>, vector<8x32xbf16>, vector<8x32xf32> -> vector<8x32xf32>
    %61 = arith.addf %55, %60 : vector<8x32xf32>
    %62 = vector.extract_strided_slice %49 {offsets = [2, 0, 0], sizes = [1, 8, 8], strides = [1, 1, 1]} : vector<4x8x8xbf16> to vector<1x8x8xbf16>
    %63 = vector.shape_cast %62 : vector<1x8x8xbf16> to vector<8x8xbf16>
    %c2 = arith.constant 2 : index
    %c0_40 = arith.constant 0 : index
    %c0_41 = arith.constant 0 : index
    %64 = vector.load %arg13[%c2, %c0_40, %c0_41] : memref<4x8x32xbf16, #tpu.memory_space<vmem>>, vector<1x8x32xbf16>
    %65 = vector.shape_cast %64 : vector<1x8x32xbf16> to vector<8x32xbf16>
    %cst_42 = arith.constant dense<0.000000e+00> : vector<8x32xf32>
    %66 = tpu.matmul %63, %65, %cst_42 {dimension_numbers = #tpu.dot_dimension_numbers<[1], [0], [0], [1], [0, 0, 1, 1], [], []>} : vector<8x8xbf16>, vector<8x32xbf16>, vector<8x32xf32> -> vector<8x32xf32>
    %67 = arith.addf %61, %66 : vector<8x32xf32>
    %68 = vector.extract_strided_slice %49 {offsets = [3, 0, 0], sizes = [1, 8, 8], strides = [1, 1, 1]} : vector<4x8x8xbf16> to vector<1x8x8xbf16>
    %69 = vector.shape_cast %68 : vector<1x8x8xbf16> to vector<8x8xbf16>
    %c3 = arith.constant 3 : index
    %c0_43 = arith.constant 0 : index
    %c0_44 = arith.constant 0 : index
    %70 = vector.load %arg13[%c3, %c0_43, %c0_44] : memref<4x8x32xbf16, #tpu.memory_space<vmem>>, vector<1x8x32xbf16>
    %71 = vector.shape_cast %70 : vector<1x8x32xbf16> to vector<8x32xbf16>
    %cst_45 = arith.constant dense<0.000000e+00> : vector<8x32xf32>
    %72 = tpu.matmul %69, %71, %cst_45 {dimension_numbers = #tpu.dot_dimension_numbers<[1], [0], [0], [1], [0, 0, 1, 1], [], []>} : vector<8x8xbf16>, vector<8x32xbf16>, vector<8x32xf32> -> vector<8x32xf32>
    %73 = arith.addf %67, %72 : vector<8x32xf32>
    %c0_46 = arith.constant 0 : index
    %c0_47 = arith.constant 0 : index
    %74 = vector.load %arg15[%c0_46, %c0_47] : memref<1x32xf32, #tpu.memory_space<vmem>>, vector<1x32xf32>
    %75 = vector.broadcast %74 : vector<1x32xf32> to vector<8x32xf32>
    %76 = arith.addf %73, %75 : vector<8x32xf32>
    %77 = arith.addf %76, %4 : vector<8x32xf32>
    %c0_48 = arith.constant 0 : index
    %c0_49 = arith.constant 0 : index
    %c0_50 = arith.constant 0 : index
    %78 = vector.load %arg16[%c0_48, %c0_49, %c0_50] : memref<1x8x32xf32, #tpu.memory_space<vmem>>, vector<1x8x32xf32>
    %79 = vector.shape_cast %78 : vector<1x8x32xf32> to vector<8x32xf32>
    %80 = vector.shape_cast %77 : vector<8x32xf32> to vector<1x8x32xf32>
    tpu.vector_store %arg16[%c0_48, %c0_49, %c0_50], %80 {strides = array<i32>} : memref<1x8x32xf32, #tpu.memory_space<vmem>>, vector<1x8x32xf32>,
    return
  }
  func.func @transform_0(%arg0: i32, %arg1: i32) -> (i32, i32, i32) {
    %c0_i32 = arith.constant 0 : i32
    %c0_i32_0 = arith.constant 0 : i32
    return %arg0, %arg1, %c0_i32 : i32, i32, i32
  }
  func.func @transform_1(%arg0: i32, %arg1: i32) -> (i32, i32, i32) {
    %c0_i32 = arith.constant 0 : i32
    %c0_i32_0 = arith.constant 0 : i32
    %c0_i32_1 = arith.constant 0 : i32
    return %arg0, %c0_i32, %c0_i32_0 : i32, i32, i32
  }
  func.func @transform_2(%arg0: i32, %arg1: i32) -> (i32, i32, i32) {
    %c0_i32 = arith.constant 0 : i32
    %c0_i32_0 = arith.constant 0 : i32
    %c0_i32_1 = arith.constant 0 : i32
    return %arg0, %c0_i32, %c0_i32_0 : i32, i32, i32
  }
  func.func @transform_3(%arg0: i32, %arg1: i32) -> (i32, i32, i32) {
    %c0_i32 = arith.constant 0 : i32
    %c0_i32_0 = arith.constant 0 : i32
    return %arg0, %arg1, %c0_i32 : i32, i32, i32
  }
  func.func @transform_4(%arg0: i32, %arg1: i32) -> (i32, i32, i32) {
    %c0_i32 = arith.constant 0 : i32
    %c0_i32_0 = arith.constant 0 : i32
    return %arg0, %arg1, %c0_i32 : i32, i32, i32
  }
  func.func @transform_5(%arg0: i32, %arg1: i32) -> (i32, i32, i32) {
    %c0_i32 = arith.constant 0 : i32
    %c0_i32_0 = arith.constant 0 : i32
    %c0_i32_1 = arith.constant 0 : i32
    %c0_i32_2 = arith.constant 0 : i32
    return %c0_i32, %c0_i32_0, %c0_i32_1 : i32, i32, i32
  }
  func.func @transform_6(%arg0: i32, %arg1: i32) -> (i32, i32, i32) {
    %c0_i32 = arith.constant 0 : i32
    %c0_i32_0 = arith.constant 0 : i32
    %c0_i32_1 = arith.constant 0 : i32
    %c0_i32_2 = arith.constant 0 : i32
    return %c0_i32, %c0_i32_0, %c0_i32_1 : i32, i32, i32
  }
  func.func @transform_7(%arg0: i32, %arg1: i32) -> (i32, i32, i32) {
    %c0_i32 = arith.constant 0 : i32
    %c0_i32_0 = arith.constant 0 : i32
    %c0_i32_1 = arith.constant 0 : i32
    %c0_i32_2 = arith.constant 0 : i32
    return %c0_i32, %c0_i32_0, %c0_i32_1 : i32, i32, i32
  }
  func.func @transform_8(%arg0: i32, %arg1: i32) -> (i32, i32, i32) {
    %c0_i32 = arith.constant 0 : i32
    %c0_i32_0 = arith.constant 0 : i32
    %c0_i32_1 = arith.constant 0 : i32
    %c0_i32_2 = arith.constant 0 : i32
    return %c0_i32, %c0_i32_0, %c0_i32_1 : i32, i32, i32
  }
  func.func @transform_9(%arg0: i32, %arg1: i32) -> (i32, i32, i32) {
    %c0_i32 = arith.constant 0 : i32
    %c0_i32_0 = arith.constant 0 : i32
    %c0_i32_1 = arith.constant 0 : i32
    %c0_i32_2 = arith.constant 0 : i32
    return %c0_i32, %c0_i32_0, %c0_i32_1 : i32, i32, i32
  }
  func.func @transform_10(%arg0: i32, %arg1: i32) -> (i32, i32, i32) {
    %c0_i32 = arith.constant 0 : i32
    %c0_i32_0 = arith.constant 0 : i32
    %c0_i32_1 = arith.constant 0 : i32
    %c0_i32_2 = arith.constant 0 : i32
    return %c0_i32, %c0_i32_0, %c0_i32_1 : i32, i32, i32
  }
  func.func @transform_11(%arg0: i32, %arg1: i32) -> (i32, i32, i32) {
    %c0_i32 = arith.constant 0 : i32
    %c0_i32_0 = arith.constant 0 : i32
    %c0_i32_1 = arith.constant 0 : i32
    %c0_i32_2 = arith.constant 0 : i32
    return %c0_i32, %c0_i32_0, %c0_i32_1 : i32, i32, i32
  }
  func.func @transform_12(%arg0: i32, %arg1: i32) -> (i32, i32) {
    %c0_i32 = arith.constant 0 : i32
    %c0_i32_0 = arith.constant 0 : i32
    %c0_i32_1 = arith.constant 0 : i32
    return %c0_i32, %c0_i32_0 : i32, i32
  }
  func.func @transform_13(%arg0: i32, %arg1: i32) -> (i32, i32) {
    %c0_i32 = arith.constant 0 : i32
    %c0_i32_0 = arith.constant 0 : i32
    %c0_i32_1 = arith.constant 0 : i32
    return %c0_i32, %c0_i32_0 : i32, i32
  }
  func.func @transform_14(%arg0: i32, %arg1: i32) -> (i32, i32, i32) {
    %c0_i32 = arith.constant 0 : i32
    %c0_i32_0 = arith.constant 0 : i32
    return %arg0, %arg1, %c0_i32 : i32, i32, i32
  }
  func.func @transform_15(%arg0: i32, %arg1: i32) -> (i32, i32, i32, i32) {
    %c0_i32 = arith.constant 0 : i32
    %c0_i32_0 = arith.constant 0 : i32
    %c0_i32_1 = arith.constant 0 : i32
    return %c0_i32, %arg0, %arg1, %c0_i32_0 : i32, i32, i32, i32
  }
}

</mosaic_0001>

<bundles_post_ra>
// kernel: tpu_custom_call.1
= control target key start
LH: loop header
LB: loop body
LE: loop exit
PB: predicated region body
PF: predicated region fallthrough
CT: control target
= control target key end

     0   :  { %s3435_s0 = inlined_call_operand.vmem [shape: f32[2,8,32], index: 0, kind: input, shape index: {}]   ;;  %s3436_s1 = inlined_call_operand.vmem [shape: f32[2,8,32], index: 1, kind: input, shape index: {}]   ;;  %s3437_s2 = inlined_call_operand.vmem [shape: f32[2,8,32], index: 2, kind: input, shape index: {}]   ;;  %s3438_s3 = inlined_call_operand.vmem [shape: bf16[2,8,8], index: 3, kind: input, shape index: {}]   ;;  %s3439_s4 = inlined_call_operand.vmem [shape: f32[2,8,1], index: 4, kind: input, shape index: {}]   ;;  %s3440_s5 = inlined_call_operand.vmem [shape: bf16[4,32,8], index: 5, kind: input, shape index: {}]   ;;  %s3441_s6 = inlined_call_operand.vmem [shape: f32[4,1,8], index: 6, kind: input, shape index: {}]   ;;  %s3442_s7 = inlined_call_operand.vmem [shape: bf16[4,32,8], index: 7, kind: input, shape index: {}]   ;;  %s3443_s8 = inlined_call_operand.vmem [shape: f32[4,1,8], index: 8, kind: input, shape index: {}]   ;;  %s3444_s9 = inlined_call_operand.vmem [shape: bf16[4,32,8], index: 9, kind: input, shape index: {}]   ;;  %s3445_s10 = inlined_call_operand.vmem [shape: f32[4,1,8], index: 10, kind: input, shape index: {}]   ;;  %s3446_s11 = inlined_call_operand.vmem [shape: bf16[4,8,32], index: 11, kind: input, shape index: {}]   ;;  %s3447_s12 = inlined_call_operand.vmem [shape: bf16[32,32], index: 12, kind: input, shape index: {}]   ;;  %s3448_s13 = inlined_call_operand.vmem [shape: f32[1,32], index: 13, kind: input, shape index: {}]   ;;  %s3449_s14 = inlined_call_operand.hbm [shape: f32[2,8,32], index: 14, kind: output, shape index: {0}]   ;;  %s3450_s15 = inlined_call_operand.hbm [shape: f32[4,2,8,8], index: 15, kind: output, shape index: {1}]  }
   0x1   :  { %3454 = sst [smem:[#allocation13_spill]] %s3435_s0 }
   0x2   :  { %3455 = sst [smem:[#allocation14_spill]] %s3436_s1 }
   0x3   :  { %3456 = sst [smem:[#allocation15_spill]] %s3442_s7 }
   0x4   :  { %21 = vsyncpa [#allocation5], 0 }
   0x5   :  { %23 = vsyncpa [#allocation5 + $0x1], 0 }
   0x6   :  { %24 = vsyncpa [#allocation7], 0 }
   0x7   :  { %26 = vsyncpa [#allocation7 + $0x1], 0  ;;  %s2951_s17 = smov 0   ;;  %s2953_s18 = smov 0  }
   0x8   :  { %s2955_s19 = smov 0   ;;  %s2957_s20 = smov 0  }
   0x9   :  { %s2959_s21 = smov 0   ;;  %s2961_s22 = smov 0  }
   0xa LB: > { %3457 = sst [smem:[#allocation10_spill]] %s2858_s21  ;;  %s2322_s23 = sadd.s32 4294967295, %s2862_s22   ;;  %s2862_s22 = sphi %s2961_s22, %s32_s22   ;;  %s2858_s21 = sphi %s2959_s21, %s3471_s21   ;;  %s2854_s20 = sphi %s2957_s20, %s3470_s20   ;;  %s2850_s19 = sphi %s2955_s19, %s3474_s19   ;;  %s2846_s18 = sphi %s2953_s18, %s3473_s18   ;;  %s2842_s17 = sphi %s2951_s17, %s3472_s17  }
   0xb   : > { %s2323_s4 = sadd.s32 4294967294, %s2862_s22   ;;  %s44_s24 = sadd.s32 1, %s2858_s21 }
   0xc   : > { %s378_s25 = sadd.s32 1, %s2850_s19  ;;  %p46_p0 = scmp.ge.s32.totalorder %s44_s24, 2 }
   0xd   : > { %p388_p1 = scmp.ne.s32.totalorder %s2850_s19, %s2846_s18  ;;  %p389_p2 = scmp.eq.s32.totalorder %s2322_s23, 1 }
   0xe   : > { %p394_p3 = scmp.ne.s32.totalorder %s2846_s18, %s2842_s17  ;;  %s3476_s24 = smov (%p46_p0, %s44_s24), 0 }
   0xf   : > { %3458 = sst [smem:[#allocation11_spill]] %s3476_s24  ;;  %p2991_p4 = por %p389_p2, %p388_p1 }
  0x10   : > { %p395_p5 = scmp.eq.s32.totalorder %s2323_s4, 1  ;;  %s373_s27 = ssub.s32 %s2858_s21, %s3476_s24 }
  0x11   : > { %p2326_p6 = scmp.ge.s32.totalorder %s2862_s22, 1  ;;  %p376_p7 = scmp.eq.s32.totalorder %s373_s27, 0 }
  0x12   : > { %p2998_p8 = por %p395_p5, %p394_p3  ;;  %p512_p9 = scmp.lt.s32.totalorder %s2862_s22, 3 }
  0x13   : > { %s3004_s29 = scalar_select %p376_p7, %s2850_s19, %s378_s25  }
  0x14   : > { %p513_p10 = pnand %p2326_p6, %p512_p9 }
  0x15   : > { %3461 = sst [smem:[#allocation12_spill]] %s3004_s29  ;;  %s3462_s7 = sld [smem:[#allocation15_spill]] (!%p513_p10)  ;;  %v2864_v1 = vmov (!%p513_p10), 0.0   ;;  %vm2865_vm0 = vmmov (!%p513_p10), 0   ;;  %vm683_vm1 = vcmask (!%p513_p10), 261120   ;;  %v2718_v11 = vld [vmem:[%s3444_s9] sm:$0xff] (!%p513_p10)  }
  0x16   : > { %516 = sbr.rel (%p513_p10) target bundleno = 1278 (0x4fe), region = 76  ;;  %2469 = vmatprep.subr.bf16.mxu0 (!%p513_p10), %v2864_v1  ;;  %2477 = vmatprep.subr.bf16.mxu1 (!%p513_p10), %v2864_v1  ;;  %p589_p11 = scmp.lt.s32.totalorder (!%p513_p10), %s2854_s20, 1  ;;  %v2719_v12 = vld [vmem:[%s3444_s9 + $0x10] sm:$0xff] (!%p513_p10)   ;;  %v2720_v13 = vld [vmem:[%s3444_s9 + $0x8] sm:$0xff] (!%p513_p10)   ;;  %v2721_v14 = vld [vmem:[%s3444_s9 + $0x18] sm:$0xff] (!%p513_p10)   ;;  %vm1142_vm2 = vcmask (!%p513_p10), 60416  }
  0x17   : > { %2473 = vmatprep.mubr.msk.bf16.mxu0 (!%p513_p10), %vm2865_vm0, %v2864_v1  ;;  %2481 = vmatprep.mubr.msk.bf16.mxu1 (!%p513_p10), %vm2865_vm0, %v2864_v1  ;;  %s3463_s1 = sld [smem:[#allocation14_spill]] (!%p513_p10)  ;;  %v2722_v17 = vld [vmem:[%s3444_s9 + $0x20] sm:$0xff] (!%p513_p10)   ;;  %v2723_v18 = vld [vmem:[%s3444_s9 + $0x30] sm:$0xff] (!%p513_p10)   ;;  %v2724_v19 = vld [vmem:[%s3444_s9 + $0x28] sm:$0xff] (!%p513_p10)   ;;  %s3464_s0 = sld [smem:[#allocation13_spill]] (!%p513_p10)  ;;  %vm1425_vm3 = vcmask (!%p513_p10), 64512  }
  0x18   : > { %v2725_v20 = vld [vmem:[%s3444_s9 + $0x38] sm:$0xff] (!%p513_p10)   ;;  %v2726_v21 = vld [vmem:[%s3440_s5] sm:$0xff] (!%p513_p10)   ;;  %v2727_v22 = vld [vmem:[%s3440_s5 + $0x10] sm:$0xff] (!%p513_p10)   ;;  %vm1682_vm4 = vcmask (!%p513_p10), 1043456   ;;  %s3453_s30 = sshll.u32 (!%p513_p10), %s2854_s20, 7 }
  0x19   : > { %v2728_v24 = vld [vmem:[%s3440_s5 + $0x8] sm:$0xff] (!%p513_p10)   ;;  %v2729_v25 = vld [vmem:[%s3440_s5 + $0x18] sm:$0xff] (!%p513_p10)   ;;  %v2730_v27 = vld [vmem:[%s3440_s5 + $0x20] sm:$0xff] (!%p513_p10)   ;;  %s3347_s25 = scalar_lea.hbm (!%p513_p10), %s3450_s15, %s3453_s30 }
  0x1a   : > { %v2731_v28 = vld [vmem:[%s3440_s5 + $0x30] sm:$0xff] (!%p513_p10)   ;;  %v2732_v29 = vld [vmem:[%s3440_s5 + $0x28] sm:$0xff] (!%p513_p10)   ;;  %v2733_v30 = vld [vmem:[%s3440_s5 + $0x38] sm:$0xff] (!%p513_p10)  }
  0x1b   : > { %v2710_v0 = vld [vmem:[%s3462_s7] sm:$0xff] (!%p513_p10)   ;;  %v2711_v2 = vld [vmem:[%s3462_s7 + $0x10] sm:$0xff] (!%p513_p10)   ;;  %v2712_v3 = vld [vmem:[%s3462_s7 + $0x8] sm:$0xff] (!%p513_p10)  }
  0x1c   : > { %2470 = vmatpush3.bf16.msra.mxu0 (!%p513_p10), %v2710_v0  ;;  %2478 = vmatpush3.bf16.msra.mxu1 (!%p513_p10), %v2711_v2  ;;  %v2713_v4 = vld [vmem:[%s3462_s7 + $0x18] sm:$0xff] (!%p513_p10)   ;;  %v2714_v6 = vld [vmem:[%s3462_s7 + $0x20] sm:$0xff] (!%p513_p10)   ;;  %v2715_v7 = vld [vmem:[%s3462_s7 + $0x30] sm:$0xff] (!%p513_p10)  }
  0x1d   : > { %2471 = vmatprep.subr.bf16.mxu0 %v2864_v1  ;;  %2479 = vmatprep.subr.bf16.mxu1 %v2864_v1  ;;  %s3028_s23 = scalar_select %p589_p11, %s2854_s20, 1  ;;  %v2716_v9 = vld [vmem:[%s3462_s7 + $0x28] sm:$0xff]   ;;  %v2717_v10 = vld [vmem:[%s3462_s7 + $0x38] sm:$0xff]   ;;  %v2333_v31 = vld [vmem:[%s3443_s8] ss:$0 sm:$0xff] }
  0x1e   : > { %v2334_v32 = vld [vmem:[%s3443_s8 + $0x1] ss:$0 sm:$0xff]  ;;  %v2335_v45 = vld [vmem:[%s3443_s8 + $0x2] ss:$0 sm:$0xff]  ;;  %v2336_v46 = vld [vmem:[%s3443_s8 + $0x3] ss:$0 sm:$0xff] }
  0x1f   : > { %s3031_s4 = sshll.u32 %s3028_s23, 3  ;;  %v2349_v63 = vld [vmem:[%s3445_s10] ss:$0 sm:$0xff]  ;;  %v2350_v0 = vld [vmem:[%s3445_s10 + $0x1] ss:$0 sm:$0xff]  ;;  %s2332_s16 = sshll.u32 %s3028_s23, 2 }
  0x20   : > { %2472 = vmatpush3.bf16.msra.mxu0 %v2712_v3  ;;  %2480 = vmatpush3.bf16.msra.mxu1 %v2713_v4  ;;  %s599_s24 = scalar_lea.vmem %s3463_s1, %s3031_s4  ;;  %s603_s27 = scalar_lea.vmem %s3437_s2, %s3031_s4 }
  0x21   : > { %2485 = vmatprep.subr.bf16.mxu0 %v2864_v1  ;;  %v623_v5 = vld [vmem:[%s599_s24] sm:$0xff]  ;;  %2493 = vmatprep.subr.bf16.mxu1 %v2864_v1  ;;  %s3266_s23 = sand.u32 1, %s2846_s18   ;;  %s2866_s7 = smov [#allocation6]  }
  0x22   : > { %v624_v8 = vpack.c.bf16 %v623_v5, %v623_v5  ;;  %v625_v15 = vld [vmem:[%s603_s27] sm:$0xff]  ;;  %s595_s27 = scalar_lea.vmem %s3464_s0, %s3031_s4  ;;  %s2328_s24 = sshll.u32 %s3266_s23, 5 }
  0x23   : > { %v626_v16 = vpack.c.bf16 %v625_v15, %v625_v15  ;;  %v3121_v23 = vld [vmem:[%s595_s27] sm:$0xff]  ;;  %s610_s27 = scalar_lea.vmem %s3438_s3, %s2332_s16  ;;  %s3271_s21 = scalar_lea.vmem [#allocation6], %s2328_s24 }
  0x24   : > { %2474 = vmatmul.mubr.msk.bf16.vlgmr.msra.gmra.mrb[0].mxu0 %vm683_vm1, %v624_v8  ;;  %2482 = vmatmul.mubr.msk.bf16.vlgmr.msra.gmra.mrb[0].mxu1 %vm683_vm1, %v624_v8  ;;  %v3137_v26 = vpack.c.bf16 %v3121_v23, %v3121_v23  ;;  %v2352_v15 = vld [vmem:[%s3445_s10 + $0x3] ss:$0 sm:$0xff]  ;;  %s2756_s4 = sshll.u32 %s2866_s7, 4  ;;  %s2757_s4 = int_to_ptr.vmem [resolvable:$false] %s2756_s4 }
  0x25   : > { %2486 = vmatpush3.bf16.msra.mxu0 %v2714_v6  ;;  %2494 = vmatpush3.bf16.msra.mxu1 %v2715_v7  ;;  %s2758_s0 = scalar_lea.vmem %s2757_s4, 1024 }
  0x26   : > { %2487 = vmatprep.subr.bf16.mxu0 %v2864_v1  ;;  %2495 = vmatprep.subr.bf16.mxu1 %v2864_v1 }
  0x27   : > { %2489 = vmatprep.mubr.msk.bf16.mxu0 %vm2865_vm0, %v2864_v1  ;;  %2497 = vmatprep.mubr.msk.bf16.mxu1 %vm2865_vm0, %v2864_v1 }
  0x29   : > { %2488 = vmatpush3.bf16.msra.mxu0 %v2716_v9  ;;  %2496 = vmatpush3.bf16.msra.mxu1 %v2717_v10 }
  0x2a   : > { %2501 = vmatprep.subr.bf16.mxu0 %v2864_v1  ;;  %2509 = vmatprep.subr.bf16.mxu1 %v2864_v1 }
  0x2c   : > { %2490 = vmatmul.mubr.msk.bf16.vlgmr.msra.gmra.mrb[4].mxu0 %vm683_vm1, %v624_v8  ;;  %2498 = vmatmul.mubr.msk.bf16.vlgmr.msra.gmra.mrb[4].mxu1 %vm683_vm1, %v624_v8 }
  0x2d   : > { %2502 = vmatpush3.bf16.msra.mxu0 %v2718_v11  ;;  %2510 = vmatpush3.bf16.msra.mxu1 %v2719_v12 }
  0x2e   : > { %2503 = vmatprep.subr.bf16.mxu0 %v2864_v1  ;;  %2511 = vmatprep.subr.bf16.mxu1 %v2864_v1 }
  0x2f   : > { %2505 = vmatprep.mubr.msk.bf16.mxu0 %vm2865_vm0, %v2864_v1  ;;  %2513 = vmatprep.mubr.msk.bf16.mxu1 %vm2865_vm0, %v2864_v1 }
  0x31   : > { %2504 = vmatpush3.bf16.msra.mxu0 %v2720_v13  ;;  %2512 = vmatpush3.bf16.msra.mxu1 %v2721_v14  ;;  %v2351_v14 = vld [vmem:[%s3445_s10 + $0x2] ss:$0 sm:$0xff] }
  0x32   : > { %2517 = vmatprep.subr.bf16.mxu0 %v2864_v1  ;;  %2525 = vmatprep.subr.bf16.mxu1 %v2864_v1 }
  0x34   : > { %2506 = vmatmul.mubr.msk.bf16.vlgmr.msra.gmra.mrb[8].mxu0 %vm683_vm1, %v626_v16  ;;  %2514 = vmatmul.mubr.msk.bf16.vlgmr.msra.gmra.mrb[8].mxu1 %vm683_vm1, %v626_v16 }
  0x35   : > { %2518 = vmatpush3.bf16.msra.mxu0 %v2722_v17  ;;  %2526 = vmatpush3.bf16.msra.mxu1 %v2723_v18 }
  0x36   : > { %2519 = vmatprep.subr.bf16.mxu0 %v2864_v1  ;;  %2527 = vmatprep.subr.bf16.mxu1 %v2864_v1 }
  0x37   : > { %2521 = vmatprep.mubr.msk.bf16.mxu0 %vm2865_vm0, %v2864_v1  ;;  %2529 = vmatprep.mubr.msk.bf16.mxu1 %vm2865_vm0, %v2864_v1 }
  0x39   : > { %2520 = vmatpush3.bf16.msra.mxu0 %v2724_v19  ;;  %2528 = vmatpush3.bf16.msra.mxu1 %v2725_v20 }
  0x3a   : > { %2533 = vmatprep.subr.bf16.mxu0 %v2864_v1  ;;  %2541 = vmatprep.subr.bf16.mxu1 %v2864_v1 }
  0x3c   : > { %2522 = vmatmul.mubr.msk.bf16.vlgmr.msra.gmra.mrb[12].mxu0 %vm683_vm1, %v626_v16  ;;  %2530 = vmatmul.mubr.msk.bf16.vlgmr.msra.gmra.mrb[12].mxu1 %vm683_vm1, %v626_v16 }
  0x3d   : > { %2534 = vmatpush3.bf16.msra.mxu0 %v2726_v21  ;;  %2542 = vmatpush3.bf16.msra.mxu1 %v2727_v22 }
  0x3e   : > { %2535 = vmatprep.subr.bf16.mxu0 %v2864_v1  ;;  %2543 = vmatprep.subr.bf16.mxu1 %v2864_v1 }
  0x3f   : > { %2537 = vmatprep.mubr.msk.bf16.mxu0 %vm2865_vm0, %v2864_v1  ;;  %2545 = vmatprep.mubr.msk.bf16.mxu1 %vm2865_vm0, %v2864_v1 }
  0x41   : > { %2536 = vmatpush3.bf16.msra.mxu0 %v2728_v24  ;;  %2544 = vmatpush3.bf16.msra.mxu1 %v2729_v25 }
  0x42   : > { %2549 = vmatprep.subr.bf16.mxu0 %v2864_v1  ;;  %2557 = vmatprep.subr.bf16.mxu1 %v2864_v1 }
  0x44   : > { %2538 = vmatmul.mubr.msk.bf16.vlgmr.msra.gmra.mrb[16].mxu0 %vm683_vm1, %v3137_v26  ;;  %2546 = vmatmul.mubr.msk.bf16.vlgmr.msra.gmra.mrb[16].mxu1 %vm683_vm1, %v3137_v26 }
  0x45   : > { %2550 = vmatpush3.bf16.msra.mxu0 %v2730_v27  ;;  %2558 = vmatpush3.bf16.msra.mxu1 %v2731_v28 }
  0x46   : > { %2551 = vmatprep.subr.bf16.mxu0 %v2864_v1  ;;  %2559 = vmatprep.subr.bf16.mxu1 %v2864_v1 }
  0x47   : > { %2553 = vmatprep.mubr.msk.bf16.mxu0 %vm2865_vm0, %v2864_v1  ;;  %2561 = vmatprep.mubr.msk.bf16.mxu1 %vm2865_vm0, %v2864_v1 }
  0x49   : > { %2552 = vmatpush3.bf16.msra.mxu0 %v2732_v29  ;;  %2560 = vmatpush3.bf16.msra.mxu1 %v2733_v30  ;;  %v2365_v30 = vld [vmem:[%s3441_s6] ss:$0 sm:$0xff] }
  0x4a   : > { %2565 = vmatprep.subr.bf16.mxu0 %v2864_v1  ;;  %2571 = vmatprep.subr.bf16.mxu1 %v2864_v1 }
  0x4c   : > { %2554 = vmatmul.mubr.msk.bf16.vlgmr.msra.gmra.mrb[20].mxu0 %vm683_vm1, %v3137_v26  ;;  %2562 = vmatmul.mubr.msk.bf16.vlgmr.msra.gmra.mrb[20].mxu1 %vm683_vm1, %v3137_v26 }
  0x4d   : > { %2567 = vmatprep.mubr.msk.bf16.mxu0 %vm2865_vm0, %v2864_v1  ;;  %2573 = vmatprep.mubr.msk.bf16.mxu1 %vm2865_vm0, %v2864_v1 }
  0xf7   : > { %v721_v33 = vpop.f32.mrb[0].mxu0  ;;  %v773_v34 = vpop.f32.mrb[0].mxu1 }
  0xf8   : > { %v722_v35 = vadd.f32 %v2333_v31, %v721_v33  ;;  %v2475_v36 = vpop.f32.mrb[1].mxu0  ;;  %v774_v37 = vadd.f32 %v2334_v32, %v773_v34  ;;  %v2483_v38 = vpop.f32.mrb[1].mxu1  ;;  %v2366_v31 = vld [vmem:[%s3441_s6 + $0x1] ss:$0 sm:$0xff] }
  0xf9   : > { %v724_v39 = vpop.f32.mrb[2].mxu0  ;;  %v776_v40 = vpop.f32.mrb[2].mxu1 }
  0xfa   : > { %v1138_v41 = vpack.c.bf16 %v722_v35, %v722_v35  ;;  %v2476_v42 = vpop.f32.mrb[3].mxu0  ;;  %v1139_v43 = vpack.c.bf16 %v774_v37, %v774_v37  ;;  %v2484_v44 = vpop.f32.mrb[3].mxu1 }
  0xfc   : > { %1143 = vst.msk [vmem:[#allocation2] sm:$0xf] %vm1142_vm2, %v1138_v41  ;;  %1144 = vst.msk [vmem:[#allocation2 + $0x4] sm:$0xf] %vm1142_vm2, %v1139_v43 }
  0xff   : > { %v825_v47 = vpop.f32.mrb[4].mxu0  ;;  %v877_v48 = vpop.f32.mrb[4].mxu1 }
 0x100   : > { %v826_v49 = vadd.f32 %v2335_v45, %v825_v47  ;;  %v2491_v50 = vpop.f32.mrb[5].mxu0  ;;  %v878_v51 = vadd.f32 %v2336_v46, %v877_v48  ;;  %v2499_v52 = vpop.f32.mrb[5].mxu1  ;;  %v2367_v48 = vld [vmem:[%s3441_s6 + $0x2] ss:$0 sm:$0xff] }
 0x101   : > { %v828_v53 = vpop.f32.mrb[6].mxu0  ;;  %v880_v54 = vpop.f32.mrb[6].mxu1 }
 0x102   : > { %v1140_v55 = vpack.c.bf16 %v826_v49, %v826_v49  ;;  %v2492_v56 = vpop.f32.mrb[7].mxu0  ;;  %v1141_v57 = vpack.c.bf16 %v878_v51, %v878_v51  ;;  %v2500_v58 = vpop.f32.mrb[7].mxu1  ;;  %v2368_v49 = vld [vmem:[%s3441_s6 + $0x3] ss:$0 sm:$0xff] }
 0x103   : > { %v1421_v59 = vld [vmem:[#allocation2] sm:$0xf]  ;;  %v1422_v60 = vld [vmem:[#allocation2 + $0x4] sm:$0xf] }
 0x104   : > { %1145 = vst.msk [vmem:[#allocation2 + $0x8] sm:$0xf] %vm1142_vm2, %v1140_v55  ;;  %1146 = vst.msk [vmem:[#allocation2 + $0xc] sm:$0xf] %vm1142_vm2, %v1141_v57  ;;  %v1430_v61 = vsel %vm1425_vm3, %v1421_v59, 0  ;;  %v1476_v62 = vsel %vm1425_vm3, %v1422_v60, 0 }
 0x105   : > { %2566 = vmatpush3.bf16.xpose.msra.mxu0 %v1430_v61  ;;  %2572 = vmatpush3.bf16.xpose.msra.mxu1 %v1476_v62 }
 0x106   : > { %2577 = vmatprep.subr.bf16.mxu0 %v2864_v1  ;;  %2583 = vmatprep.subr.bf16.mxu1 %v2864_v1 }
 0x107   : > { %v976_v2 = vpop.f32.mrb[8].mxu0  ;;  %v1028_v3 = vpop.f32.mrb[8].mxu1 }
 0x108   : > { %v977_v4 = vadd.f32 %v2349_v63, %v976_v2  ;;  %v2507_v5 = vpop.f32.mrb[9].mxu0  ;;  %v1029_v6 = vadd.f32 %v2350_v0, %v1028_v3  ;;  %v2515_v7 = vpop.f32.mrb[9].mxu1 }
 0x109   : > { %v979_v8 = vpop.f32.mrb[10].mxu0  ;;  %v1031_v9 = vpop.f32.mrb[10].mxu1  ;;  %v1610_v7 = vld [vmem:[%s610_s27] sm:$0xf]  ;;  %s2161_s27 = sshll.u32 %s3271_s21, 4  ;;  %s3350_s27 = int_to_ptr.vmem [resolvable:$true] %s2161_s27 }
 0x10a   : > { %v1147_v10 = vpack.c.bf16 %v977_v4, %v977_v4  ;;  %v2508_v11 = vpop.f32.mrb[11].mxu0  ;;  %v1148_v12 = vpack.c.bf16 %v1029_v6, %v1029_v6  ;;  %v2516_v13 = vpop.f32.mrb[11].mxu1  ;;  %v1611_v8 = vunpack.c.l.bf16 %v1610_v7  ;;  %v2735_v9 = vld [vmem:[%s3447_s12 + $0x8] sm:$0xff]   ;;  %s2752_s29 = scalar_lea.vmem %s3350_s27, 512  ;;  %p2759_p1 = scmp.lt.s32.totalorder %s3350_s27, %s2757_s4 }
 0x10b   : > { %v1423_v44 = vld [vmem:[#allocation2 + $0x8] sm:$0xf]  ;;  %v1424_v45 = vld [vmem:[#allocation2 + $0xc] sm:$0xf]  ;;  %p2753_p12 = scmp.ne.s32.totalorder %s3350_s27, %s2752_s29  ;;  %p2760_p2 = scmp.lt.s32.totalorder %s2758_s0, %s2752_s29 }
 0x10c   : > { %1151 = vst.msk [vmem:[#allocation3] sm:$0xf] %vm1142_vm2, %v1147_v10  ;;  %1152 = vst.msk [vmem:[#allocation3 + $0x4] sm:$0xf] %vm1142_vm2, %v1148_v12  ;;  %v1522_v50 = vsel %vm1425_vm3, %v1423_v44, 0  ;;  %v1568_v51 = vsel %vm1425_vm3, %v1424_v45, 0 }
 0x10d   : > { %vm3245_vm5 = vcmp.gt.f32.partialorder %v1611_v8, 0.0  ;;  %p2754_p13 = pnand %p2753_p12, %p2991_p4  ;;  %p2761_p3 = por %p2760_p2, %p2759_p1 }
 0x10f   : > { %v1080_v16 = vpop.f32.mrb[12].mxu0  ;;  %v1132_v17 = vpop.f32.mrb[12].mxu1  ;;  %p2755_p0 = pneg %p2754_p13 }
 0x110   : > { %v1081_v18 = vadd.f32 %v2351_v14, %v1080_v16  ;;  %v2523_v19 = vpop.f32.mrb[13].mxu0  ;;  %v1133_v20 = vadd.f32 %v2352_v15, %v1132_v17  ;;  %v2531_v21 = vpop.f32.mrb[13].mxu1 }
 0x111   : > { %v1083_v22 = vpop.f32.mrb[14].mxu0  ;;  %v1135_v24 = vpop.f32.mrb[14].mxu1  ;;  %p2762_p5 = pnand %p2761_p3, %p2755_p0 }
 0x112   : > { %v1149_v25 = vpack.c.bf16 %v1081_v18, %v1081_v18  ;;  %v2524_v27 = vpop.f32.mrb[15].mxu0  ;;  %v1150_v28 = vpack.c.bf16 %v1133_v20, %v1133_v20  ;;  %v2532_v29 = vpop.f32.mrb[15].mxu1 }
 0x113   : > { %v1675_v0 = vld [vmem:[#allocation3] sm:$0xf]  ;;  %v1676_v2 = vld [vmem:[#allocation3 + $0x4] sm:$0xf] }
 0x114   : > { %1153 = vst.msk [vmem:[#allocation3 + $0x8] sm:$0xf] %vm1142_vm2, %v1149_v25  ;;  %1154 = vst.msk [vmem:[#allocation3 + $0xc] sm:$0xf] %vm1142_vm2, %v1150_v28  ;;  %v1684_v5 = vsel %vm1682_vm4, %v1675_v0, 0  ;;  %v1730_v6 = vsel %vm1682_vm4, %v1676_v2, 0 }
 0x117   : > { %v1251_v32 = vpop.f32.mrb[16].mxu0  ;;  %v1303_v33 = vpop.f32.mrb[16].mxu1 }
 0x118   : > { %v1252_v34 = vadd.f32 %v2365_v30, %v1251_v32  ;;  %v1304_v35 = vadd.f32 %v2366_v31, %v1303_v33  ;;  %v2539_v36 = vpop.f32.mrb[17].mxu0  ;;  %v2547_v37 = vpop.f32.mrb[17].mxu1 }
 0x119   : > { %v1254_v38 = vpop.f32.mrb[18].mxu0  ;;  %v1306_v39 = vpop.f32.mrb[18].mxu1 }
 0x11a   : > { %v1413_v40 = vmul.f32 0.35355338, %v1252_v34  ;;  %v1414_v41 = vmul.f32 0.35355338, %v1304_v35  ;;  %v2540_v42 = vpop.f32.mrb[19].mxu0  ;;  %v2548_v43 = vpop.f32.mrb[19].mxu1 }
 0x11c   : > { %v1417_v46 = vpack.c.bf16 %v1413_v40, %v1413_v40  ;;  %v1418_v47 = vpack.c.bf16 %v1414_v41, %v1414_v41 }
 0x11e   : > { %2568 = vmatmul.mubr.msk.bf16.vlgmr.msra.gmra.mrb[24].mxu0 %vm1425_vm3, %v1417_v46  ;;  %2574 = vmatmul.mubr.msk.bf16.vlgmr.msra.gmra.mrb[24].mxu1 %vm1425_vm3, %v1418_v47 }
 0x11f   : > { %2578 = vmatpush3.bf16.xpose.msra.mxu0 %v1522_v50  ;;  %2584 = vmatpush3.bf16.xpose.msra.mxu1 %v1568_v51  ;;  %v1355_v52 = vpop.f32.mrb[20].mxu0  ;;  %v1407_v53 = vpop.f32.mrb[20].mxu1 }
 0x120   : > { %v1356_v54 = vadd.f32 %v2367_v48, %v1355_v52  ;;  %v1408_v55 = vadd.f32 %v2368_v49, %v1407_v53  ;;  %v2555_v56 = vpop.f32.mrb[21].mxu0  ;;  %2579 = vmatprep.mubr.msk.bf16.mxu0 %vm2865_vm0, %v2864_v1  ;;  %2585 = vmatprep.mubr.msk.bf16.mxu1 %vm2865_vm0, %v2864_v1  ;;  %v2563_v57 = vpop.f32.mrb[21].mxu1 }
 0x121   : > { %v1358_v58 = vpop.f32.mrb[22].mxu0  ;;  %2589 = vmatprep.subr.bf16.mxu0 %v2864_v1  ;;  %2595 = vmatprep.subr.bf16.mxu1 %v2864_v1  ;;  %v1410_v59 = vpop.f32.mrb[22].mxu1 }
 0x122   : > { %v1415_v60 = vmul.f32 0.35355338, %v1356_v54  ;;  %v1416_v61 = vmul.f32 0.35355338, %v1408_v55  ;;  %v2556_v62 = vpop.f32.mrb[23].mxu0  ;;  %v2564_v63 = vpop.f32.mrb[23].mxu1 }
 0x123   : > { %v1677_v63 = vld [vmem:[#allocation3 + $0x8] sm:$0xf] }
 0x124   : > { %v1419_v3 = vpack.c.bf16 %v1415_v60, %v1415_v60  ;;  %v1420_v4 = vpack.c.bf16 %v1416_v61, %v1416_v61 }
 0x126   : > { %2580 = vmatmul.mubr.msk.bf16.vlgmr.msra.gmra.mrb[28].mxu0 %vm1425_vm3, %v1419_v3  ;;  %2586 = vmatmul.mubr.msk.bf16.vlgmr.msra.gmra.mrb[28].mxu1 %vm1425_vm3, %v1420_v4  ;;  %v1776_v4 = vsel %vm1682_vm4, %v1677_v63, 0 }
 0x127   : > { %2590 = vmatpush3.bf16.msra.mxu0 %v1684_v5  ;;  %2596 = vmatpush3.bf16.msra.mxu1 %v1730_v6  ;;  %v1678_v6 = vld [vmem:[#allocation3 + $0xc] sm:$0xf] }
 0x128   : > { %2591 = vmatprep.mubr.msk.bf16.mxu0 %vm2865_vm0, %v2864_v1  ;;  %2601 = vmatprep.subr.bf16.mxu0 %v2864_v1 }
 0x129   : > { %2597 = vmatprep.mubr.msk.bf16.mxu1 %vm2865_vm0, %v2864_v1  ;;  %2607 = vmatprep.subr.bf16.mxu1 %v2864_v1 }
 0x1f1   : > { %v1466_v10 = vpop.f32.mrb[24].mxu0  ;;  %v1512_v11 = vpop.f32.mrb[24].mxu1 }
 0x1f2   : > { %v1615_v12 = vsel %vm3245_vm5, -3.4028235e+38, %v1466_v10  ;;  %v2569_v13 = vpop.f32.mrb[25].mxu0  ;;  %v1616_v14 = vsel %vm3245_vm5, -3.4028235e+38, %v1512_v11  ;;  %v2575_v15 = vpop.f32.mrb[25].mxu1 }
 0x1f3   : > { %v1469_v16 = vpop.f32.mrb[26].mxu0  ;;  %v1619_v17 = vsel %vm1425_vm3, %v1615_v12, -inf  ;;  %v1515_v18 = vpop.f32.mrb[26].mxu1  ;;  %v1622_v21 = vsel %vm1425_vm3, %v1616_v14, -inf  ;;  %v1872_v11 = vld [vmem:[%s3446_s11] sm:$0xf] }
 0x1f4   : > { %1620 = vmax.xlane.f32.xlu0 %v1619_v17  ;;  %v2570_v19 = vpop.f32.mrb[27].mxu0  ;;  %v2576_v20 = vpop.f32.mrb[27].mxu1  ;;  %v1877_v16 = vsel %vm1682_vm4, %v1872_v11, 0 }
 0x1f5   : > { %v2734_v19 = vld [vmem:[%s3447_s12] sm:$0xff]  }
 0x1f8   : > { %1623 = vmax.xlane.f32.xlu0 %v1622_v21  ;;  %v2395_v21 = vld [vmem:[%s3446_s11 + $0x8] sm:$0xf] }
 0x1f9   : > { %v1558_v22 = vpop.f32.mrb[28].mxu0  ;;  %v1604_v24 = vpop.f32.mrb[28].mxu1 }
 0x1fa   : > { %v1617_v25 = vsel %vm3245_vm5, -3.4028235e+38, %v1558_v22  ;;  %v2581_v27 = vpop.f32.mrb[29].mxu0  ;;  %v1618_v28 = vsel %vm3245_vm5, -3.4028235e+38, %v1604_v24  ;;  %v2587_v29 = vpop.f32.mrb[29].mxu1 }
 0x1fb   : > { %v1625_v30 = vsel %vm1425_vm3, %v1617_v25, -inf  ;;  %v1561_v31 = vpop.f32.mrb[30].mxu0  ;;  %v1607_v32 = vpop.f32.mrb[30].mxu1  ;;  %v1628_v35 = vsel %vm1425_vm3, %v1618_v28, -inf  ;;  %v2026_v22 = vsel %vm1682_vm4, %v2395_v21, 0 }
 0x1fc   : > { %1626 = vmax.xlane.f32.xlu1 %v1625_v30  ;;  %v2582_v33 = vpop.f32.mrb[31].mxu0  ;;  %v2588_v34 = vpop.f32.mrb[31].mxu1  ;;  %v2393_v24 = vld [vmem:[%s3446_s11 + $0x4] sm:$0xf] }
 0x1fd   : > { %v1977_v29 = vsel %vm1682_vm4, %v2393_v24, 0  ;;  %v2397_v34 = vld [vmem:[%s3446_s11 + $0xc] sm:$0xf] }
 0x200   : > { %1629 = vmax.xlane.f32.xlu1 %v1628_v35 }
 0x281   : > { %v1621_v36 = vpop.xlane.xlu0 %1620 }
 0x282   : > { %v1631_v37 = vsub.f32 %v1615_v12, %v1621_v36  ;;  %v1822_v12 = vsel %vm1682_vm4, %v1678_v6, 0 }
 0x284   : > { %v1635_v38 = vmul.f32 1.442695, %v1631_v37 }
 0x285   : > { %v1624_v39 = vpop.xlane.xlu0 %1623 }
 0x286   : > { %2736 = vpow2.f32 %v1635_v38  ;;  %v1632_v40 = vsub.f32 %v1616_v14, %v1624_v39 }
 0x288   : > { %v1637_v41 = vmul.f32 1.442695, %v1632_v40  ;;  %v2075_v40 = vsel %vm1682_vm4, %v2397_v34, 0 }
 0x289   : > { %v1627_v42 = vpop.xlane.xlu1 %1626 }
 0x28a   : > { %2738 = vpow2.f32 %v1637_v41  ;;  %v1633_v43 = vsub.f32 %v1617_v25, %v1627_v42 }
 0x28c   : > { %v1639_v44 = vmul.f32 1.442695, %v1633_v43 }
 0x28d   : > { %v1630_v45 = vpop.xlane.xlu1 %1629 }
 0x28e   : > { %2740 = vpow2.f32 %v1639_v44  ;;  %v1634_v46 = vsub.f32 %v1618_v28, %v1630_v45 }
 0x290   : > { %v2737_v47 = vpop.eup %2736  ;;  %v1641_v48 = vmul.f32 1.442695, %v1634_v46 }
 0x291   : > { %v1643_v49 = vsel %vm1425_vm3, %v2737_v47, 0.0 }
 0x292   : > { %2742 = vpow2.f32 %v1641_v48  ;;  %1644 = vadd.xlane.f32.xlu0 %v1643_v49 }
 0x294   : > { %v2739_v50 = vpop.eup %2738 }
 0x295   : > { %v1646_v51 = vsel %vm1425_vm3, %v2739_v50, 0.0 }
 0x296   : > { %1647 = vadd.xlane.f32.xlu1 %v1646_v51 }
 0x298   : > { %v2741_v52 = vpop.eup %2740 }
 0x299   : > { %v1649_v53 = vsel %vm1425_vm3, %v2741_v52, 0.0 }
 0x29a   : > { %1650 = vadd.xlane.f32.xlu0 %v1649_v53 }
 0x29c   : > { %v2743_v54 = vpop.eup %2742 }
 0x29d   : > { %v1652_v55 = vsel %vm1425_vm3, %v2743_v54, 0.0 }
 0x29e   : > { %1653 = vadd.xlane.f32.xlu1 %v1652_v55 }
 0x31f   : > { %v1645_v56 = vpop.xlane.xlu0 %1644 }
 0x320   : > { %2744 = vrcp.f32 %v1645_v56 }
 0x323   : > { %v1648_v57 = vpop.xlane.xlu1 %1647 }
 0x324   : > { %2746 = vrcp.f32 %v1648_v57 }
 0x327   : > { %v1651_v58 = vpop.xlane.xlu0 %1650 }
 0x328   : > { %2748 = vrcp.f32 %v1651_v58 }
 0x32a   : > { %v2745_v59 = vpop.eup %2744 }
 0x32b   : > { %v1659_v60 = vmul.f32 %v2745_v59, %v2737_v47  ;;  %v1654_v61 = vpop.xlane.xlu1 %1653 }
 0x32c   : > { %2750 = vrcp.f32 %v1654_v61 }
 0x32d   : > { %v1663_v62 = vsel %vm3245_vm5, 0.0, %v1659_v60 }
 0x32e   : > { %v2747_v0 = vpop.eup %2746  ;;  %v1671_v2 = vpack.c.bf16 %v1663_v62, %v1663_v62  ;;  %1667 = vst.msk [vmem:[%s3271_s21] sm:$0xff] %vm1425_vm3, %v1663_v62 }
 0x32f   : > { %v1660_v3 = vmul.f32 %v2747_v0, %v2739_v50 }
 0x330   : > { %2592 = vmatmul.mubr.msk.bf16.vlgmr.msra.gmra.mrb[32].mxu0 %vm1425_vm3, %v1671_v2 }
 0x331   : > { %2602 = vmatpush3.bf16.msra.mxu0 %v1776_v4  ;;  %v1664_v5 = vsel %vm3245_vm5, 0.0, %v1660_v3  ;;  %2603 = vmatprep.mubr.msk.bf16.mxu0 %vm2865_vm0, %v2864_v1 }
 0x332   : > { %v2749_v7 = vpop.eup %2748  ;;  %v1672_v8 = vpack.c.bf16 %v1664_v5, %v1664_v5  ;;  %2613 = vmatprep.subr.bf16.mxu0 %v2864_v1  ;;  %1668 = vst.msk [vmem:[%s3271_s21 + $0x8] sm:$0xff] %vm1425_vm3, %v1664_v5 }
 0x333   : > { %v1661_v10 = vmul.f32 %v2749_v7, %v2741_v52 }
 0x334   : > { %2598 = vmatmul.mubr.msk.bf16.vlgmr.msra.gmra.mrb[32].mxu1 %vm1425_vm3, %v1672_v8 }
 0x335   : > { %v1665_v13 = vsel %vm3245_vm5, 0.0, %v1661_v10  ;;  %2608 = vmatpush3.bf16.msra.mxu1 %v1822_v12  ;;  %2609 = vmatprep.mubr.msk.bf16.mxu1 %vm2865_vm0, %v2864_v1 }
 0x336   : > { %v2751_v14 = vpop.eup %2750  ;;  %v1673_v15 = vpack.c.bf16 %v1665_v13, %v1665_v13  ;;  %2619 = vmatprep.subr.bf16.mxu1 %v2864_v1  ;;  %1669 = vst.msk [vmem:[%s3271_s21 + $0x10] sm:$0xff] %vm1425_vm3, %v1665_v13 }
 0x337   : > { %v1662_v17 = vmul.f32 %v2751_v14, %v2743_v54 }
 0x338   : > { %2604 = vmatmul.mubr.msk.bf16.vlgmr.msra.gmra.mrb[36].mxu0 %vm1425_vm3, %v1673_v15 }
 0x339   : > { %v1666_v18 = vsel %vm3245_vm5, 0.0, %v1662_v17  ;;  %2614 = vmatpush3.bf16.msra.mxu0 %v1877_v16  ;;  %2615 = vmatprep.mubr.msk.bf16.mxu0 %vm2865_vm0, %v2864_v1 }
 0x33a   : > { %v1674_v20 = vpack.c.bf16 %v1666_v18, %v1666_v18  ;;  %2627 = vmatprep.subr.bf16.mxu0 %v2864_v1  ;;  %1670 = vst.msk [vmem:[%s3271_s21 + $0x18] sm:$0xff] %vm1425_vm3, %v1666_v18 }
 0x33c   : > { %2610 = vmatmul.mubr.msk.bf16.vlgmr.msra.gmra.mrb[36].mxu1 %vm1425_vm3, %v1674_v20 }
 0x33d   : > { %2620 = vmatpush3.bf16.msra.mxu1 %v2734_v19  ;;  %2623 = vmatprep.mubr.msk.bf16.mxu1 %vm2865_vm0, %v2864_v1 }
 0x33e   : > { %2621 = vmatprep.subr.bf16.mxu1 %v2864_v1 }
 0x341   : > { %2622 = vmatpush3.bf16.msra.mxu1 %v2735_v9 }
 0x342   : > { %2633 = vmatprep.subr.bf16.mxu1 %v2864_v1 }
 0x344   : > { %2624 = vmatmul.mubr.msk.bf16.vlgmr.msra.gmra.mrb[40].mxu1 %vm683_vm1, %v3137_v26 }
 0x345   : > { %2635 = vmatprep.mubr.msk.bf16.mxu1 %vm2865_vm0, %v2864_v1  ;;  %2634 = vmatpush3.bf16.msra.mxu1 %v2026_v22 }
 0x403   : > { %v1720_v25 = vpop.f32.mrb[32].mxu0 }
 0x404   : > { %v1868_v27 = vpack.c.bf16 %v1720_v25, %v1720_v25  ;;  %v2593_v28 = vpop.f32.mrb[33].mxu0 }
 0x405   : > { %v1723_v26 = vpop.f32.mrb[34].mxu0 }
 0x406   : > { %v2594_v30 = vpop.f32.mrb[35].mxu0  ;;  %2616 = vmatmul.mubr.msk.bf16.vlgmr.msra.gmra.mrb[40].mxu0 %vm1425_vm3, %v1868_v27 }
 0x407   : > { %v1766_v31 = vpop.f32.mrb[32].mxu1  ;;  %2628 = vmatpush3.bf16.msra.mxu0 %v1977_v29  ;;  %2629 = vmatprep.mubr.msk.bf16.mxu0 %vm2865_vm0, %v2864_v1 }
 0x408   : > { %v2599_v32 = vpop.f32.mrb[33].mxu1  ;;  %2639 = vmatprep.subr.bf16.mxu0 %v2864_v1  ;;  %v1869_v37 = vpack.c.bf16 %v1766_v31, %v1766_v31 }
 0x409   : > { %v1769_v33 = vpop.f32.mrb[34].mxu1 }
 0x40a   : > { %v2600_v35 = vpop.f32.mrb[35].mxu1 }
 0x40b   : > { %v1812_v36 = vpop.f32.mrb[36].mxu0 }
 0x40c   : > { %v1870_v38 = vpack.c.bf16 %v1812_v36, %v1812_v36  ;;  %v2605_v39 = vpop.f32.mrb[37].mxu0 }
 0x40d   : > { %v1815_v41 = vpop.f32.mrb[38].mxu0 }
 0x40e   : > { %v2606_v42 = vpop.f32.mrb[39].mxu0  ;;  %2630 = vmatmul.mubr.msk.bf16.vlgmr.msra.gmra.mrb[44].mxu0 %vm1425_vm3, %v1869_v37  ;;  %2636 = vmatmul.mubr.msk.bf16.vlgmr.msra.gmra.mrb[44].mxu1 %vm1425_vm3, %v1870_v38 }
 0x40f   : > { %v1858_v43 = vpop.f32.mrb[36].mxu1  ;;  %2640 = vmatpush3.bf16.msra.mxu0 %v2075_v40  ;;  %2641 = vmatprep.mubr.msk.bf16.mxu0 %vm2865_vm0, %v2864_v1 }
 0x410   : > { %v2611_v44 = vpop.f32.mrb[37].mxu1  ;;  %v1871_v47 = vpack.c.bf16 %v1858_v43, %v1858_v43 }
 0x411   : > { %v1861_v45 = vpop.f32.mrb[38].mxu1 }
 0x412   : > { %v2612_v46 = vpop.f32.mrb[39].mxu1 }
 0x416   : > { %2642 = vmatmul.mubr.msk.bf16.vlgmr.msra.gmra.mrb[48].mxu0 %vm1425_vm3, %v1871_v47 }
 0x417   : > { %v1965_v48 = vpop.f32.mrb[40].mxu1 }
 0x418   : > { %v2625_v49 = vpop.f32.mrb[41].mxu1 }
 0x419   : > { %v1968_v50 = vpop.f32.mrb[42].mxu1 }
 0x41a   : > { %v2626_v51 = vpop.f32.mrb[43].mxu1 }
 0x41b   : > { %2765 = shalt.err (!%p2762_p5)
}
 0x41c   : > { %s2766_s21 = scalar_lea.hbm %s3347_s25, 512  ;;  %s2770_s7 = scalar_lea.hbm %s3450_s15, 1024 }
 0x41d   : > { %p2767_p6 = scmp.ne.s32.totalorder %s3347_s25, %s2766_s21  ;;  %p2771_p10 = scmp.lt.u32.totalorder %s3347_s25, %s3450_s15 }
 0x41e   : > { %p2772_p11 = scmp.lt.u32.totalorder %s2770_s7, %s2766_s21  ;;  %p2774_p13 = scmp.lt.u32.totalorder %s2766_s21, %s3347_s25 }
 0x41f   : > { %p2768_p7 = pnand %p2767_p6, %p2991_p4 }
 0x420   : > { %p2773_p12 = por %p2772_p11, %p2771_p10 }
 0x421   : > { %p2769_p9 = pneg %p2768_p7 }
 0x422   : > { %p2775_p0 = por %p2774_p13, %p2773_p12 }
 0x424   : > { %p2776_p1 = pnand %p2775_p0, %p2769_p9 }
 0x426   : > { %2779 = shalt.err (!%p2776_p1)
}
 0x427   : > { %s2867_s0 = smov 128   ;;  %s2868_s29 = smov 256   ;;  %v2399_v4 = vld [vmem:[%s3448_s13] ss:$0 sm:$0xff] }
 0x428   : > { %s2869_s24 = smov 8   ;;  %s3467_s16 = scalar_lea.sflag [#allocation7], %s3266_s23 }
 0x429   : > { %2646 = dma.vmem_to_hbm [thread:$0]  (%p2991_p4), %s3350_s27, 512, %s3347_s25, %s3467_s16, %s2867_s0, %s2868_s29, %s2869_s24  }
 0x42a   : > { %s2327_s30 = sshll.u32 %s3266_s23, 3  ;;  %s3468_s1 = sshll.u32 %s2854_s20, 7 }
 0x42b   : > { %s581_s24 = scalar_lea.vmem [#allocation4], %s2327_s30  ;;  %s3386_s0 = scalar_lea.hbm %s3449_s14, %s3468_s1 }
 0x42c   : > { %s2148_s21 = sshll.u32 %s581_s24, 4  ;;  %s2129_s29 = scalar_lea.sflag [#allocation5], %s3266_s23  ;;  %s3388_s21 = int_to_ptr.vmem [resolvable:$true] %s2148_s21 }
 0x42d   : > { %s2780_s16 = scalar_lea.vmem %s3388_s21, 128  ;;  %s2870_s30 = smov [#allocation4]  }
 0x42e   : > { %p2781_p2 = scmp.ne.s32.totalorder %s3388_s21, %s2780_s16  ;;  %s2784_s20 = sshll.u32 %s2870_s30, 4  ;;  %s2785_s20 = int_to_ptr.vmem [resolvable:$false] %s2784_s20 }
 0x42f   : > { %s2786_s25 = scalar_lea.vmem %s2785_s20, 256  ;;  %p2787_p6 = scmp.lt.s32.totalorder %s3388_s21, %s2785_s20 }
 0x430   : > { %p2782_p3 = pnand %p2781_p2, %p2991_p4  ;;  %p2788_p7 = scmp.lt.s32.totalorder %s2786_s25, %s2780_s16 }
 0x432   : > { %p2783_p5 = pneg %p2782_p3  ;;  %p2789_p9 = por %p2788_p7, %p2787_p6 }
 0x434   : > { %p2790_p10 = pnand %p2789_p9, %p2783_p5 }
 0x4d9   : > { %v1913_v1 = vpop.f32.mrb[40].mxu0 }
 0x4da   : > { %v1966_v52 = vadd.f32 %v1965_v48, %v1913_v1  ;;  %v2617_v53 = vpop.f32.mrb[41].mxu0 }
 0x4db   : > { %v1916_v54 = vpop.f32.mrb[42].mxu0 }
 0x4dc   : > { %v2618_v55 = vpop.f32.mrb[43].mxu0 }
 0x4e1   : > { %v2013_v56 = vpop.f32.mrb[44].mxu0  ;;  %v2062_v57 = vpop.f32.mrb[44].mxu1 }
 0x4e2   : > { %v2019_v58 = vadd.f32 %v2013_v56, %v1966_v52  ;;  %v2631_v59 = vpop.f32.mrb[45].mxu0  ;;  %v2637_v60 = vpop.f32.mrb[45].mxu1 }
 0x4e3   : > { %v2016_v61 = vpop.f32.mrb[46].mxu0  ;;  %v2065_v62 = vpop.f32.mrb[46].mxu1 }
 0x4e4   : > { %v2068_v63 = vadd.f32 %v2062_v57, %v2019_v58  ;;  %v2632_v0 = vpop.f32.mrb[47].mxu0  ;;  %v2638_v2 = vpop.f32.mrb[47].mxu1 }
 0x4e9   : > { %v2111_v3 = vpop.f32.mrb[48].mxu0 }
 0x4ea   : > { %v2117_v5 = vadd.f32 %v2111_v3, %v2068_v63  ;;  %v2643_v6 = vpop.f32.mrb[49].mxu0 }
 0x4eb   : > { %v2114_v7 = vpop.f32.mrb[50].mxu0 }
 0x4ec   : > { %v2125_v8 = vadd.f32 %v2399_v4, %v2117_v5  ;;  %v2644_v10 = vpop.f32.mrb[51].mxu0 }
 0x4ee   : > { %v2126_v11 = vadd.f32 %v2125_v8, %v3121_v23 }
 0x4f0   : > { %2127 = vst.msk [vmem:[%s581_s24] sm:$0xff] %vm683_vm1, %v2126_v11 }
 0x4f1   : > { %2793 = shalt.err (!%p2790_p10)
}
 0x4f2   : > { %s2794_s23 = scalar_lea.hbm %s3386_s0, 128  ;;  %s2798_s1 = scalar_lea.hbm %s3449_s14, 256 }
 0x4f3   : > { %p2795_p11 = scmp.ne.s32.totalorder %s3386_s0, %s2794_s23  ;;  %p2799_p0 = scmp.lt.u32.totalorder %s3386_s0, %s3449_s14 }
 0x4f4   : > { %p2800_p1 = scmp.lt.u32.totalorder %s2798_s1, %s2794_s23  ;;  %p2802_p3 = scmp.lt.u32.totalorder %s2794_s23, %s3386_s0 }
 0x4f5   : > { %p2796_p12 = pnand %p2795_p11, %p2991_p4 }
 0x4f6   : > { %p2801_p2 = por %p2800_p1, %p2799_p0 }
 0x4f7   : > { %p2797_p13 = pneg %p2796_p12 }
 0x4f8   : > { %p2803_p5 = por %p2802_p3, %p2801_p2 }
 0x4fa   : > { %p2804_p6 = pnand %p2803_p5, %p2797_p13 }
 0x4fc   : > { %2807 = shalt.err (!%p2804_p6)
}
 0x4fd   : > { %2645 = dma.vmem_to_hbm [thread:$0]  (%p2991_p4), %s3388_s21, 128, %s3386_s0, %s2129_s29  }
 0x4fe PF: > { %p2656_p7 = scmp.ge.s32.totalorder %s2862_s22, 2  ;;  %s2176_s16 = sand.u32 1, %s2842_s17  }
 0x4ff   : > { %s2177_s30 = scalar_lea.sflag [#allocation5], %s2176_s16 }
 0x500   : > { %p2650_p9 = pnand %p2656_p7, %p2998_p8 }
 0x502   : > { %2833 = dma.done.wait (!%p2650_p9), %s2177_s30, 128  }
 0x503   : > { %2835 = vsyncadd (!%p2650_p9), %s2177_s30, 4294967168  ;;  %s2186_s20 = scalar_lea.sflag [#allocation7], %s2176_s16 }
 0x504   : > { %2837 = dma.done.wait (!%p2650_p9), %s2186_s20, 512  }
 0x505   : > { %2839 = vsyncadd (!%p2650_p9), %s2186_s20, 4294966784  ;;  %s32_s22 = sadd.s32 1, %s2862_s22   ;;  %s3469_s26 = sld [smem:[#allocation12_spill]] }
 0x506   : > { %p29_p10 = scmp.ge.s32.totalorder %s32_s22, 4   ;;  %s3470_s20 = sld [smem:[#allocation10_spill]] }
 0x507   : > { %s3471_s21 = sld [smem:[#allocation11_spill]]  ;;  %s3472_s17 = smov %s2846_s18 }
 0x508   : > { %s3473_s18 = smov %s2850_s19  ;;  %31 = sbr.rel (!%p29_p10) target bundleno = 10 (0xa), region = 147 }
 0x50b   : > { %s3474_s19 = smov %s3469_s26 }
 0x50f   :  { %2191 = vsyncpa [#allocation5], 1 }
 0x510   :  { %2193 = vsyncpa [#allocation5 + $0x1], 1 }
 0x511   :  { %2194 = vsyncpa [#allocation7], 1 }
 0x512   :  { %2196 = vsyncpa [#allocation7 + $0x1], 1 }

</bundles_post_ra>
